<compile_context>
chip_gen: v7x
topology: tpu7x:2x2x1
jax: 0.10.0
libtpu: 0.0.40
codegen_flags: <defaults>
</compile_context>

<pallas_src>
import functools

import jax
import jax.numpy as jnp
from jax.experimental import pallas as pl
from jax.experimental.pallas import tpu as pltpu


def _rewrite_lstm_kernel(pad_id, mask_id, seq, bsz,
                         tok_ref, subj_ref, x_ref,
                         wab_ref, whh_ref, bias_ref,
                         w1_ref, b1_ref, out_ref):
    """Fused biLSTM (2 layers, packed-sequence masking) + Linear head + passthrough.

    All arrays are time-major: row index = t * bsz + b.

    Ref shapes (full-array VMEM blocks):
      tok_ref  : (N, 1)      int32    token ids                (N = seq * bsz)
      subj_ref : (N, 1)      int32    subjects mask (0/1)
      x_ref    : (N, H)      f32      input embeddings
      wab_ref  : (2, H, 8H)  bf16     per layer: input->gates, [fwd cols | bwd cols]
      whh_ref  : (2, H, 4H)  bf16     per layer: block-diag recurrent weights
      bias_ref : (2, 1, 8H)  f32      per layer: b_ih + b_hh in first 4H lanes, 0 after
      w1_ref   : (H, H)      bf16     mlp_head weight, pre-transposed (in, out)
      b1_ref   : (1, H)      f32
      out_ref  : (N, H)      f32

    Fused gate lane layout (G = 4H = 8*Hc lanes):
      [ i_f | i_b | f_f | f_b | o_f | o_b | g_f | g_b ]   (each Hc wide)
    so every H-wide gate slice lines up with the fused state h = c = [fwd(Hc)|bwd(Hc)].
    """
    N, H = x_ref.shape
    Hc = H // 2
    G = 4 * H

    # ---- packed-sequence validity per fused [fwd|bwd] step (built once, off chain).
    # At step s the fwd direction processes time s, the bwd direction time seq-1-s.
    # Zeroing the state at invalid steps reproduces pack_padded_sequence semantics.
    attn = (tok_ref[...] != pad_id).astype(jnp.float32)               # (N, 1)
    fwd_half = jax.lax.broadcasted_iota(jnp.int32, (bsz, H), 1) < Hc  # hoisted
    step_mask = []
    for s in range(seq):
        vf = attn[s * bsz:(s + 1) * bsz]                              # (bsz, 1)
        vb = attn[(seq - 1 - s) * bsz:(seq - s) * bsz]                # (bsz, 1)
        step_mask.append(jnp.where(fwd_half, vf, vb))                 # (bsz, H)

    fwd_sel = jax.lax.broadcasted_iota(jnp.int32, (N, H), 1) < Hc     # slab assembly

    layer_in = x_ref[...]                                             # (N, H) f32
    for layer in range(2):
        w_ab = wab_ref[layer]                                         # (H, 2G) bf16
        w_hh = whh_ref[layer]                                         # (H, G)  bf16
        bias = bias_ref[layer]                                        # (1, 2G) f32

        # One batched input->gates projection (both directions) for all timesteps.
        gx = (jnp.dot(layer_in.astype(jnp.bfloat16), w_ab,
                      preferred_element_type=jnp.float32) + bias)     # (N, 2G)

        h = jnp.zeros((bsz, H), jnp.float32)                          # [h_fwd | h_bwd]
        c = jnp.zeros((bsz, H), jnp.float32)                          # [c_fwd | c_bwd]
        h_steps = []
        for s in range(seq):                                          # static unroll
            rf = s * bsz
            rb = (seq - 1 - s) * bsz
            gates = (gx[rf:rf + bsz, :G] + gx[rb:rb + bsz, G:]
                     + jnp.dot(h.astype(jnp.bfloat16), w_hh,
                               preferred_element_type=jnp.float32))   # (bsz, G)
            # Slice first (all four lane extractions depend only on `gates` and run
            # in parallel), then activate each 32-lane gate.
            i_g = jax.nn.sigmoid(gates[:, 0:H])
            f_g = jax.nn.sigmoid(gates[:, H:2 * H])
            o_g = jax.nn.sigmoid(gates[:, 2 * H:3 * H])
            g_g = jnp.tanh(gates[:, 3 * H:])
            m = step_mask[s]
            c = m * (f_g * c + i_g * g_g)
            h = m * (o_g * jnp.tanh(c))
            h_steps.append(h)

        # Assemble the (N, H) layer output slab once (off the recurrent chain):
        # fwd halves are valid in step order, bwd halves in reversed step order.
        fwd_rows = jnp.concatenate(h_steps, axis=0)                   # (N, H)
        bwd_rows = jnp.concatenate(h_steps[::-1], axis=0)             # (N, H)
        layer_in = jnp.where(fwd_sel, fwd_rows, bwd_rows)             # (N, H)

    # mlp_head: Linear(H, H) applied per position, batched over all rows.
    y = (jnp.dot(layer_in.astype(jnp.bfloat16), w1_ref[...],
                 preferred_element_type=jnp.float32) + b1_ref[...])   # (N, H)

    # lstm_output[subj_idx] = embeddings[subj_idx]
    # lstm_output[mask_idx] = embeddings[mask_idx]
    replace = jnp.logical_or(subj_ref[...] != 0, tok_ref[...] == mask_id)   # (N, 1)
    out_ref[...] = jnp.where(jnp.broadcast_to(replace, (N, H)),
                             x_ref[...], y).astype(out_ref.dtype)


def _pack_lstm_layer(wih_f, whh_f, bih_f, bhh_f, wih_b, whh_b, bih_b, bhh_b):
    """Pack one bidirectional LSTM layer (PyTorch layout) into fused kernel operands.

    In : wih_* (4*Hc, in), whh_* (4*Hc, Hc), b*_* (4*Hc,)   gate row order (i, f, g, o)
    Out: W_AB (in, 16*Hc)  input weights: [fwd gate columns | bwd gate columns]
         Whh  (2*Hc, 8*Hc) block-diagonal recurrent weights ([h_f|h_b] -> fused gates)
         bias (1, 16*Hc)   b_ih + b_hh in the fused gate layout (first 8*Hc lanes)
    Fused gate column order: [i_f i_b | f_f f_b | o_f o_b | g_f g_b], each Hc wide.
    """
    four_hc, in_size = wih_f.shape
    Hc = four_hc // 4
    G = 8 * Hc
    pt2slot = {0: 0, 1: 1, 3: 2, 2: 3}      # PyTorch (i,f,g,o) -> fused (i,f,o,g)
    w_a = jnp.zeros((in_size, G), jnp.float32)
    w_b = jnp.zeros((in_size, G), jnp.float32)
    w_hh = jnp.zeros((2 * Hc, G), jnp.float32)
    bias = jnp.zeros((G,), jnp.float32)
    for pt in range(4):
        slot = pt2slot[pt]
        cf = slot * 2 * Hc               # forward columns of this gate
        cb = cf + Hc                     # backward columns of this gate
        rows = slice(pt * Hc, (pt + 1) * Hc)
        w_a = w_a.at[:, cf:cf + Hc].set(wih_f[rows].T)
        w_b = w_b.at[:, cb:cb + Hc].set(wih_b[rows].T)
        w_hh = w_hh.at[:Hc, cf:cf + Hc].set(whh_f[rows].T)
        w_hh = w_hh.at[Hc:, cb:cb + Hc].set(whh_b[rows].T)
        bias = bias.at[cf:cf + Hc].set(bih_f[rows] + bhh_f[rows])
        bias = bias.at[cb:cb + Hc].set(bih_b[rows] + bhh_b[rows])
    w_ab = jnp.concatenate([w_a, w_b], axis=1)                         # (in, 2G)
    bias2 = jnp.concatenate([bias, jnp.zeros((G,), jnp.float32)]).reshape(1, 2 * G)
    return w_ab, w_hh, bias2


def init_params(key, hidden_size):
    """Synthetic parameters in PyTorch layout, packed for the kernel."""
    H = hidden_size
    Hc = H // 2
    b_lstm = 1.0 / float(Hc) ** 0.5
    b_lin = 1.0 / float(H) ** 0.5
    keys = list(jax.random.split(key, 18))

    def u(shape, bound):
        return jax.random.uniform(keys.pop(0), shape, jnp.float32, -bound, bound)

    wab_l, whh_l, bias_l = [], [], []
    for _layer in range(2):
        wih_f, whh_f = u((4 * Hc, H), b_lstm), u((4 * Hc, Hc), b_lstm)
        bih_f, bhh_f = u((4 * Hc,), b_lstm), u((4 * Hc,), b_lstm)
        wih_b, whh_b = u((4 * Hc, H), b_lstm), u((4 * Hc, Hc), b_lstm)
        bih_b, bhh_b = u((4 * Hc,), b_lstm), u((4 * Hc,), b_lstm)
        w_ab, w_hh, bias = _pack_lstm_layer(wih_f, whh_f, bih_f, bhh_f,
                                            wih_b, whh_b, bih_b, bhh_b)
        wab_l.append(w_ab); whh_l.append(w_hh); bias_l.append(bias)

    w1 = u((H, H), b_lin)                                 # PyTorch (out, in)
    b1 = u((H,), b_lin)

    return {
        "wab": jnp.stack(wab_l).astype(jnp.bfloat16),     # (2, H, 8H)
        "whh": jnp.stack(whh_l).astype(jnp.bfloat16),     # (2, H, 4H)
        "bias": jnp.stack(bias_l),                        # (2, 1, 8H) f32
        "w1_t": w1.T.astype(jnp.bfloat16),                # (H, H), (in, out)
        "b1": b1.reshape(1, H),                           # (1, H) f32
    }


def prompt_encoder_rewrite_lstm_forward(tokens, embeddings, subjects_mask, params,
                                        pad_token_id, mask_token_id):
    """forward(tokens, embeddings) of PromptEncoderRewriteLSTMSubjMask (eval mode)."""
    bsz, seq = tokens.shape
    H = embeddings.shape[-1]
    N = seq * bsz

    # Time-major, lane-dense 2-D slabs (layout plumbing only).
    tok_tm = jnp.transpose(tokens.astype(jnp.int32), (1, 0)).reshape(N, 1)
    subj_tm = jnp.transpose(subjects_mask.astype(jnp.int32), (1, 0)).reshape(N, 1)
    x_tm = jnp.transpose(embeddings.astype(jnp.float32), (1, 0, 2)).reshape(N, H)

    kernel = functools.partial(_rewrite_lstm_kernel,
                               int(pad_token_id), int(mask_token_id), seq, bsz)
    vmem = pl.BlockSpec(memory_space=pltpu.MemorySpace.VMEM)
    inputs = (tok_tm, subj_tm, x_tm,
              params["wab"], params["whh"], params["bias"],
              params["w1_t"], params["b1"])
    out_tm = pl.pallas_call(
        kernel,
        out_shape=jax.ShapeDtypeStruct((N, H), jnp.float32),
        in_specs=[vmem] * len(inputs),
        out_specs=vmem,
        compiler_params=pltpu.CompilerParams(vmem_limit_bytes=32 * 1024 * 1024),
    )(*inputs)

    return jnp.transpose(out_tm.reshape(seq, bsz, H), (1, 0, 2))


if __name__ == "__main__":
    hidden_size = 32
    bsz, seq = 2, 8
    vocab = 64
    pad_token_id = 0
    mask_token_id = 5

    key = jax.random.PRNGKey(0)
    k_param, k_emb, k_tok = jax.random.split(key, 3)

    params = init_params(k_param, hidden_size)
    embeddings = (0.02 * jax.random.normal(k_emb, (bsz, seq, hidden_size))).astype(jnp.float32)

    # Tokens: sequence 0 is full length, sequence 1 has 2 trailing pads; one [MASK] each.
    tokens = jax.random.randint(k_tok, (bsz, seq), 6, vocab, dtype=jnp.int32)
    tokens = tokens.at[0, 3].set(mask_token_id)
    tokens = tokens.at[1, 2].set(mask_token_id)
    tokens = tokens.at[1, 6:].set(pad_token_id)

    subjects_mask = jnp.zeros((bsz, seq), jnp.int32)
    subjects_mask = subjects_mask.at[0, 1:3].set(1)
    subjects_mask = subjects_mask.at[1, 4:6].set(1)

    out = prompt_encoder_rewrite_lstm_forward(
        tokens, embeddings, subjects_mask, params, pad_token_id, mask_token_id)
    out = jax.block_until_ready(out)

    assert out.shape == (bsz, seq, hidden_size), out.shape
    assert bool(jnp.all(jnp.isfinite(out)))
    # subj / [MASK] positions must be passed through from the input embeddings.
    assert bool(jnp.allclose(out[0, 3], embeddings[0, 3]))
    assert bool(jnp.allclose(out[1, 2], embeddings[1, 2]))
    assert bool(jnp.allclose(out[0, 1:3], embeddings[0, 1:3]))
    assert bool(jnp.allclose(out[1, 4:6], embeddings[1, 4:6]))
    # Padded positions carry mlp_head(0) == bias (packed-LSTM zero padding semantics).
    assert bool(jnp.allclose(out[1, 7], params["b1"][0], atol=1e-6))
    print("KERNEL_OK")
</pallas_src>

<mosaic_0001>
module attributes {stable_mosaic.version = 11 : i64} {
  func.func @_rewrite_lstm_kernel(%arg0: memref<16x1xi32, #tpu.memory_space<vmem>>, %arg1: memref<16x1xi32, #tpu.memory_space<vmem>>, %arg2: memref<16x32xf32, #tpu.memory_space<vmem>>, %arg3: memref<2x32x256xbf16, #tpu.memory_space<vmem>>, %arg4: memref<2x32x128xbf16, #tpu.memory_space<vmem>>, %arg5: memref<2x1x256xf32, #tpu.memory_space<vmem>>, %arg6: memref<32x32xbf16, #tpu.memory_space<vmem>>, %arg7: memref<1x32xf32, #tpu.memory_space<vmem>>, %arg8: memref<16x32xf32, #tpu.memory_space<vmem>>) attributes {dimension_semantics = [], scalar_prefetch = 0 : i64, scratch_operands = 0 : i64, tpu.core_type = #tpu.core_type<tc>} {
    %c0 = arith.constant 0 : index
    %c0_0 = arith.constant 0 : index
    %0 = vector.load %arg0[%c0, %c0_0] : memref<16x1xi32, #tpu.memory_space<vmem>>, vector<16x1xi32>
    %c0_i32 = arith.constant 0 : i32
    %1 = vector.broadcast %c0_i32 : i32 to vector<16x1xi32>
    %2 = arith.cmpi ne, %0, %1 : vector<16x1xi32>
    %3 = arith.extui %2 : vector<16x1xi1> to vector<16x1xi32>
    %4 = arith.sitofp %3 : vector<16x1xi32> to vector<16x1xf32>
    %5 = tpu.iota {dimensions = array<i32: 1>} : vector<2x32xi32>
    %c16_i32 = arith.constant 16 : i32
    %6 = vector.broadcast %c16_i32 : i32 to vector<2x32xi32>
    %7 = arith.cmpi slt, %5, %6 : vector<2x32xi32>
    %8 = vector.extract_strided_slice %4 {offsets = [0, 0], sizes = [2, 1], strides = [1, 1]} : vector<16x1xf32> to vector<2x1xf32>
    %9 = vector.extract_strided_slice %4 {offsets = [14, 0], sizes = [2, 1], strides = [1, 1]} : vector<16x1xf32> to vector<2x1xf32>
    %10 = vector.shape_cast %8 : vector<2x1xf32> to vector<2x1xf32>
    %11 = vector.broadcast %10 : vector<2x1xf32> to vector<2x32xf32>
    %12 = vector.shape_cast %9 : vector<2x1xf32> to vector<2x1xf32>
    %13 = vector.broadcast %12 : vector<2x1xf32> to vector<2x32xf32>
    %14 = arith.select %7, %11, %13 : vector<2x32xi1>, vector<2x32xf32>
    %15 = vector.extract_strided_slice %4 {offsets = [2, 0], sizes = [2, 1], strides = [1, 1]} : vector<16x1xf32> to vector<2x1xf32>
    %16 = vector.extract_strided_slice %4 {offsets = [12, 0], sizes = [2, 1], strides = [1, 1]} : vector<16x1xf32> to vector<2x1xf32>
    %17 = vector.shape_cast %15 : vector<2x1xf32> to vector<2x1xf32>
    %18 = vector.broadcast %17 : vector<2x1xf32> to vector<2x32xf32>
    %19 = vector.shape_cast %16 : vector<2x1xf32> to vector<2x1xf32>
    %20 = vector.broadcast %19 : vector<2x1xf32> to vector<2x32xf32>
    %21 = arith.select %7, %18, %20 : vector<2x32xi1>, vector<2x32xf32>
    %22 = vector.extract_strided_slice %4 {offsets = [4, 0], sizes = [2, 1], strides = [1, 1]} : vector<16x1xf32> to vector<2x1xf32>
    %23 = vector.extract_strided_slice %4 {offsets = [10, 0], sizes = [2, 1], strides = [1, 1]} : vector<16x1xf32> to vector<2x1xf32>
    %24 = vector.shape_cast %22 : vector<2x1xf32> to vector<2x1xf32>
    %25 = vector.broadcast %24 : vector<2x1xf32> to vector<2x32xf32>
    %26 = vector.shape_cast %23 : vector<2x1xf32> to vector<2x1xf32>
    %27 = vector.broadcast %26 : vector<2x1xf32> to vector<2x32xf32>
    %28 = arith.select %7, %25, %27 : vector<2x32xi1>, vector<2x32xf32>
    %29 = vector.extract_strided_slice %4 {offsets = [6, 0], sizes = [2, 1], strides = [1, 1]} : vector<16x1xf32> to vector<2x1xf32>
    %30 = vector.extract_strided_slice %4 {offsets = [8, 0], sizes = [2, 1], strides = [1, 1]} : vector<16x1xf32> to vector<2x1xf32>
    %31 = vector.shape_cast %29 : vector<2x1xf32> to vector<2x1xf32>
    %32 = vector.broadcast %31 : vector<2x1xf32> to vector<2x32xf32>
    %33 = vector.shape_cast %30 : vector<2x1xf32> to vector<2x1xf32>
    %34 = vector.broadcast %33 : vector<2x1xf32> to vector<2x32xf32>
    %35 = arith.select %7, %32, %34 : vector<2x32xi1>, vector<2x32xf32>
    %36 = vector.extract_strided_slice %4 {offsets = [8, 0], sizes = [2, 1], strides = [1, 1]} : vector<16x1xf32> to vector<2x1xf32>
    %37 = vector.extract_strided_slice %4 {offsets = [6, 0], sizes = [2, 1], strides = [1, 1]} : vector<16x1xf32> to vector<2x1xf32>
    %38 = vector.shape_cast %36 : vector<2x1xf32> to vector<2x1xf32>
    %39 = vector.broadcast %38 : vector<2x1xf32> to vector<2x32xf32>
    %40 = vector.shape_cast %37 : vector<2x1xf32> to vector<2x1xf32>
    %41 = vector.broadcast %40 : vector<2x1xf32> to vector<2x32xf32>
    %42 = arith.select %7, %39, %41 : vector<2x32xi1>, vector<2x32xf32>
    %43 = vector.extract_strided_slice %4 {offsets = [10, 0], sizes = [2, 1], strides = [1, 1]} : vector<16x1xf32> to vector<2x1xf32>
    %44 = vector.extract_strided_slice %4 {offsets = [4, 0], sizes = [2, 1], strides = [1, 1]} : vector<16x1xf32> to vector<2x1xf32>
    %45 = vector.shape_cast %43 : vector<2x1xf32> to vector<2x1xf32>
    %46 = vector.broadcast %45 : vector<2x1xf32> to vector<2x32xf32>
    %47 = vector.shape_cast %44 : vector<2x1xf32> to vector<2x1xf32>
    %48 = vector.broadcast %47 : vector<2x1xf32> to vector<2x32xf32>
    %49 = arith.select %7, %46, %48 : vector<2x32xi1>, vector<2x32xf32>
    %50 = vector.extract_strided_slice %4 {offsets = [12, 0], sizes = [2, 1], strides = [1, 1]} : vector<16x1xf32> to vector<2x1xf32>
    %51 = vector.extract_strided_slice %4 {offsets = [2, 0], sizes = [2, 1], strides = [1, 1]} : vector<16x1xf32> to vector<2x1xf32>
    %52 = vector.shape_cast %50 : vector<2x1xf32> to vector<2x1xf32>
    %53 = vector.broadcast %52 : vector<2x1xf32> to vector<2x32xf32>
    %54 = vector.shape_cast %51 : vector<2x1xf32> to vector<2x1xf32>
    %55 = vector.broadcast %54 : vector<2x1xf32> to vector<2x32xf32>
    %56 = arith.select %7, %53, %55 : vector<2x32xi1>, vector<2x32xf32>
    %57 = vector.extract_strided_slice %4 {offsets = [14, 0], sizes = [2, 1], strides = [1, 1]} : vector<16x1xf32> to vector<2x1xf32>
    %58 = vector.extract_strided_slice %4 {offsets = [0, 0], sizes = [2, 1], strides = [1, 1]} : vector<16x1xf32> to vector<2x1xf32>
    %59 = vector.shape_cast %57 : vector<2x1xf32> to vector<2x1xf32>
    %60 = vector.broadcast %59 : vector<2x1xf32> to vector<2x32xf32>
    %61 = vector.shape_cast %58 : vector<2x1xf32> to vector<2x1xf32>
    %62 = vector.broadcast %61 : vector<2x1xf32> to vector<2x32xf32>
    %63 = arith.select %7, %60, %62 : vector<2x32xi1>, vector<2x32xf32>
    %64 = tpu.iota {dimensions = array<i32: 1>} : vector<16x32xi32>
    %c16_i32_1 = arith.constant 16 : i32
    %65 = vector.broadcast %c16_i32_1 : i32 to vector<16x32xi32>
    %66 = arith.cmpi slt, %64, %65 : vector<16x32xi32>
    %c0_2 = arith.constant 0 : index
    %c0_3 = arith.constant 0 : index
    %67 = vector.load %arg2[%c0_2, %c0_3] : memref<16x32xf32, #tpu.memory_space<vmem>>, vector<16x32xf32>
    %c0_4 = arith.constant 0 : index
    %c0_5 = arith.constant 0 : index
    %c0_6 = arith.constant 0 : index
    %68 = vector.load %arg3[%c0_4, %c0_5, %c0_6] : memref<2x32x256xbf16, #tpu.memory_space<vmem>>, vector<1x32x256xbf16>
    %69 = vector.shape_cast %68 : vector<1x32x256xbf16> to vector<32x256xbf16>
    %c0_7 = arith.constant 0 : index
    %c0_8 = arith.constant 0 : index
    %c0_9 = arith.constant 0 : index
    %70 = vector.load %arg4[%c0_7, %c0_8, %c0_9] : memref<2x32x128xbf16, #tpu.memory_space<vmem>>, vector<1x32x128xbf16>
    %71 = vector.shape_cast %70 : vector<1x32x128xbf16> to vector<32x128xbf16>
    %c0_10 = arith.constant 0 : index
    %c0_11 = arith.constant 0 : index
    %c0_12 = arith.constant 0 : index
    %72 = vector.load %arg5[%c0_10, %c0_11, %c0_12] : memref<2x1x256xf32, #tpu.memory_space<vmem>>, vector<1x1x256xf32>
    %73 = vector.shape_cast %72 : vector<1x1x256xf32> to vector<1x256xf32>
    %74 = arith.truncf %67 : vector<16x32xf32> to vector<16x32xbf16>
    %cst = arith.constant dense<0.000000e+00> : vector<16x256xf32>
    %75 = tpu.matmul %74, %69, %cst {dimension_numbers = #tpu.dot_dimension_numbers<[1], [0], [0], [1], [0, 0, 1, 1], [], []>} : vector<16x32xbf16>, vector<32x256xbf16>, vector<16x256xf32> -> vector<16x256xf32>
    %76 = vector.broadcast %73 : vector<1x256xf32> to vector<16x256xf32>
    %77 = arith.addf %75, %76 : vector<16x256xf32>
    %cst_13 = arith.constant 0.000000e+00 : f32
    %78 = vector.broadcast %cst_13 : f32 to vector<2x32xf32>
    %cst_14 = arith.constant 0.000000e+00 : f32
    %79 = vector.broadcast %cst_14 : f32 to vector<2x32xf32>
    %80 = vector.extract_strided_slice %77 {offsets = [0, 0], sizes = [2, 128], strides = [1, 1]} : vector<16x256xf32> to vector<2x128xf32>
    %81 = vector.extract_strided_slice %77 {offsets = [14, 128], sizes = [2, 128], strides = [1, 1]} : vector<16x256xf32> to vector<2x128xf32>
    %82 = arith.addf %80, %81 : vector<2x128xf32>
    %83 = arith.truncf %78 : vector<2x32xf32> to vector<2x32xbf16>
    %cst_15 = arith.constant dense<0.000000e+00> : vector<2x128xf32>
    %84 = tpu.matmul %83, %71, %cst_15 {dimension_numbers = #tpu.dot_dimension_numbers<[1], [0], [0], [1], [0, 0, 1, 1], [], []>} : vector<2x32xbf16>, vector<32x128xbf16>, vector<2x128xf32> -> vector<2x128xf32>
    %85 = arith.addf %82, %84 : vector<2x128xf32>
    %86 = vector.extract_strided_slice %85 {offsets = [0, 0], sizes = [2, 32], strides = [1, 1]} : vector<2x128xf32> to vector<2x32xf32>
    %87 = arith.negf %86 : vector<2x32xf32>
    %88 = math.exp %87 : vector<2x32xf32>
    %cst_16 = arith.constant 1.000000e+00 : f32
    %89 = vector.broadcast %cst_16 : f32 to vector<2x32xf32>
    %90 = arith.addf %89, %88 : vector<2x32xf32>
    %91 = arith.divf %89, %90 : vector<2x32xf32>
    %92 = vector.extract_strided_slice %85 {offsets = [0, 32], sizes = [2, 32], strides = [1, 1]} : vector<2x128xf32> to vector<2x32xf32>
    %93 = arith.negf %92 : vector<2x32xf32>
    %94 = math.exp %93 : vector<2x32xf32>
    %cst_17 = arith.constant 1.000000e+00 : f32
    %95 = vector.broadcast %cst_17 : f32 to vector<2x32xf32>
    %96 = arith.addf %95, %94 : vector<2x32xf32>
    %97 = arith.divf %95, %96 : vector<2x32xf32>
    %98 = vector.extract_strided_slice %85 {offsets = [0, 64], sizes = [2, 32], strides = [1, 1]} : vector<2x128xf32> to vector<2x32xf32>
    %99 = arith.negf %98 : vector<2x32xf32>
    %100 = math.exp %99 : vector<2x32xf32>
    %cst_18 = arith.constant 1.000000e+00 : f32
    %101 = vector.broadcast %cst_18 : f32 to vector<2x32xf32>
    %102 = arith.addf %101, %100 : vector<2x32xf32>
    %103 = arith.divf %101, %102 : vector<2x32xf32>
    %104 = vector.extract_strided_slice %85 {offsets = [0, 96], sizes = [2, 32], strides = [1, 1]} : vector<2x128xf32> to vector<2x32xf32>
    %105 = math.tanh %104 : vector<2x32xf32>
    %106 = arith.mulf %97, %79 : vector<2x32xf32>
    %107 = arith.mulf %91, %105 : vector<2x32xf32>
    %108 = arith.addf %106, %107 : vector<2x32xf32>
    %109 = arith.mulf %14, %108 : vector<2x32xf32>
    %110 = math.tanh %109 : vector<2x32xf32>
    %111 = arith.mulf %103, %110 : vector<2x32xf32>
    %112 = arith.mulf %14, %111 : vector<2x32xf32>
    %113 = vector.extract_strided_slice %77 {offsets = [2, 0], sizes = [2, 128], strides = [1, 1]} : vector<16x256xf32> to vector<2x128xf32>
    %114 = vector.extract_strided_slice %77 {offsets = [12, 128], sizes = [2, 128], strides = [1, 1]} : vector<16x256xf32> to vector<2x128xf32>
    %115 = arith.addf %113, %114 : vector<2x128xf32>
    %116 = arith.truncf %112 : vector<2x32xf32> to vector<2x32xbf16>
    %cst_19 = arith.constant dense<0.000000e+00> : vector<2x128xf32>
    %117 = tpu.matmul %116, %71, %cst_19 {dimension_numbers = #tpu.dot_dimension_numbers<[1], [0], [0], [1], [0, 0, 1, 1], [], []>} : vector<2x32xbf16>, vector<32x128xbf16>, vector<2x128xf32> -> vector<2x128xf32>
    %118 = arith.addf %115, %117 : vector<2x128xf32>
    %119 = vector.extract_strided_slice %118 {offsets = [0, 0], sizes = [2, 32], strides = [1, 1]} : vector<2x128xf32> to vector<2x32xf32>
    %120 = arith.negf %119 : vector<2x32xf32>
    %121 = math.exp %120 : vector<2x32xf32>
    %cst_20 = arith.constant 1.000000e+00 : f32
    %122 = vector.broadcast %cst_20 : f32 to vector<2x32xf32>
    %123 = arith.addf %122, %121 : vector<2x32xf32>
    %124 = arith.divf %122, %123 : vector<2x32xf32>
    %125 = vector.extract_strided_slice %118 {offsets = [0, 32], sizes = [2, 32], strides = [1, 1]} : vector<2x128xf32> to vector<2x32xf32>
    %126 = arith.negf %125 : vector<2x32xf32>
    %127 = math.exp %126 : vector<2x32xf32>
    %cst_21 = arith.constant 1.000000e+00 : f32
    %128 = vector.broadcast %cst_21 : f32 to vector<2x32xf32>
    %129 = arith.addf %128, %127 : vector<2x32xf32>
    %130 = arith.divf %128, %129 : vector<2x32xf32>
    %131 = vector.extract_strided_slice %118 {offsets = [0, 64], sizes = [2, 32], strides = [1, 1]} : vector<2x128xf32> to vector<2x32xf32>
    %132 = arith.negf %131 : vector<2x32xf32>
    %133 = math.exp %132 : vector<2x32xf32>
    %cst_22 = arith.constant 1.000000e+00 : f32
    %134 = vector.broadcast %cst_22 : f32 to vector<2x32xf32>
    %135 = arith.addf %134, %133 : vector<2x32xf32>
    %136 = arith.divf %134, %135 : vector<2x32xf32>
    %137 = vector.extract_strided_slice %118 {offsets = [0, 96], sizes = [2, 32], strides = [1, 1]} : vector<2x128xf32> to vector<2x32xf32>
    %138 = math.tanh %137 : vector<2x32xf32>
    %139 = arith.mulf %130, %109 : vector<2x32xf32>
    %140 = arith.mulf %124, %138 : vector<2x32xf32>
    %141 = arith.addf %139, %140 : vector<2x32xf32>
    %142 = arith.mulf %21, %141 : vector<2x32xf32>
    %143 = math.tanh %142 : vector<2x32xf32>
    %144 = arith.mulf %136, %143 : vector<2x32xf32>
    %145 = arith.mulf %21, %144 : vector<2x32xf32>
    %146 = vector.extract_strided_slice %77 {offsets = [4, 0], sizes = [2, 128], strides = [1, 1]} : vector<16x256xf32> to vector<2x128xf32>
    %147 = vector.extract_strided_slice %77 {offsets = [10, 128], sizes = [2, 128], strides = [1, 1]} : vector<16x256xf32> to vector<2x128xf32>
    %148 = arith.addf %146, %147 : vector<2x128xf32>
    %149 = arith.truncf %145 : vector<2x32xf32> to vector<2x32xbf16>
    %cst_23 = arith.constant dense<0.000000e+00> : vector<2x128xf32>
    %150 = tpu.matmul %149, %71, %cst_23 {dimension_numbers = #tpu.dot_dimension_numbers<[1], [0], [0], [1], [0, 0, 1, 1], [], []>} : vector<2x32xbf16>, vector<32x128xbf16>, vector<2x128xf32> -> vector<2x128xf32>
    %151 = arith.addf %148, %150 : vector<2x128xf32>
    %152 = vector.extract_strided_slice %151 {offsets = [0, 0], sizes = [2, 32], strides = [1, 1]} : vector<2x128xf32> to vector<2x32xf32>
    %153 = arith.negf %152 : vector<2x32xf32>
    %154 = math.exp %153 : vector<2x32xf32>
    %cst_24 = arith.constant 1.000000e+00 : f32
    %155 = vector.broadcast %cst_24 : f32 to vector<2x32xf32>
    %156 = arith.addf %155, %154 : vector<2x32xf32>
    %157 = arith.divf %155, %156 : vector<2x32xf32>
    %158 = vector.extract_strided_slice %151 {offsets = [0, 32], sizes = [2, 32], strides = [1, 1]} : vector<2x128xf32> to vector<2x32xf32>
    %159 = arith.negf %158 : vector<2x32xf32>
    %160 = math.exp %159 : vector<2x32xf32>
    %cst_25 = arith.constant 1.000000e+00 : f32
    %161 = vector.broadcast %cst_25 : f32 to vector<2x32xf32>
    %162 = arith.addf %161, %160 : vector<2x32xf32>
    %163 = arith.divf %161, %162 : vector<2x32xf32>
    %164 = vector.extract_strided_slice %151 {offsets = [0, 64], sizes = [2, 32], strides = [1, 1]} : vector<2x128xf32> to vector<2x32xf32>
    %165 = arith.negf %164 : vector<2x32xf32>
    %166 = math.exp %165 : vector<2x32xf32>
    %cst_26 = arith.constant 1.000000e+00 : f32
    %167 = vector.broadcast %cst_26 : f32 to vector<2x32xf32>
    %168 = arith.addf %167, %166 : vector<2x32xf32>
    %169 = arith.divf %167, %168 : vector<2x32xf32>
    %170 = vector.extract_strided_slice %151 {offsets = [0, 96], sizes = [2, 32], strides = [1, 1]} : vector<2x128xf32> to vector<2x32xf32>
    %171 = math.tanh %170 : vector<2x32xf32>
    %172 = arith.mulf %163, %142 : vector<2x32xf32>
    %173 = arith.mulf %157, %171 : vector<2x32xf32>
    %174 = arith.addf %172, %173 : vector<2x32xf32>
    %175 = arith.mulf %28, %174 : vector<2x32xf32>
    %176 = math.tanh %175 : vector<2x32xf32>
    %177 = arith.mulf %169, %176 : vector<2x32xf32>
    %178 = arith.mulf %28, %177 : vector<2x32xf32>
    %179 = vector.extract_strided_slice %77 {offsets = [6, 0], sizes = [2, 128], strides = [1, 1]} : vector<16x256xf32> to vector<2x128xf32>
    %180 = vector.extract_strided_slice %77 {offsets = [8, 128], sizes = [2, 128], strides = [1, 1]} : vector<16x256xf32> to vector<2x128xf32>
    %181 = arith.addf %179, %180 : vector<2x128xf32>
    %182 = arith.truncf %178 : vector<2x32xf32> to vector<2x32xbf16>
    %cst_27 = arith.constant dense<0.000000e+00> : vector<2x128xf32>
    %183 = tpu.matmul %182, %71, %cst_27 {dimension_numbers = #tpu.dot_dimension_numbers<[1], [0], [0], [1], [0, 0, 1, 1], [], []>} : vector<2x32xbf16>, vector<32x128xbf16>, vector<2x128xf32> -> vector<2x128xf32>
    %184 = arith.addf %181, %183 : vector<2x128xf32>
    %185 = vector.extract_strided_slice %184 {offsets = [0, 0], sizes = [2, 32], strides = [1, 1]} : vector<2x128xf32> to vector<2x32xf32>
    %186 = arith.negf %185 : vector<2x32xf32>
    %187 = math.exp %186 : vector<2x32xf32>
    %cst_28 = arith.constant 1.000000e+00 : f32
    %188 = vector.broadcast %cst_28 : f32 to vector<2x32xf32>
    %189 = arith.addf %188, %187 : vector<2x32xf32>
    %190 = arith.divf %188, %189 : vector<2x32xf32>
    %191 = vector.extract_strided_slice %184 {offsets = [0, 32], sizes = [2, 32], strides = [1, 1]} : vector<2x128xf32> to vector<2x32xf32>
    %192 = arith.negf %191 : vector<2x32xf32>
    %193 = math.exp %192 : vector<2x32xf32>
    %cst_29 = arith.constant 1.000000e+00 : f32
    %194 = vector.broadcast %cst_29 : f32 to vector<2x32xf32>
    %195 = arith.addf %194, %193 : vector<2x32xf32>
    %196 = arith.divf %194, %195 : vector<2x32xf32>
    %197 = vector.extract_strided_slice %184 {offsets = [0, 64], sizes = [2, 32], strides = [1, 1]} : vector<2x128xf32> to vector<2x32xf32>
    %198 = arith.negf %197 : vector<2x32xf32>
    %199 = math.exp %198 : vector<2x32xf32>
    %cst_30 = arith.constant 1.000000e+00 : f32
    %200 = vector.broadcast %cst_30 : f32 to vector<2x32xf32>
    %201 = arith.addf %200, %199 : vector<2x32xf32>
    %202 = arith.divf %200, %201 : vector<2x32xf32>
    %203 = vector.extract_strided_slice %184 {offsets = [0, 96], sizes = [2, 32], strides = [1, 1]} : vector<2x128xf32> to vector<2x32xf32>
    %204 = math.tanh %203 : vector<2x32xf32>
    %205 = arith.mulf %196, %175 : vector<2x32xf32>
    %206 = arith.mulf %190, %204 : vector<2x32xf32>
    %207 = arith.addf %205, %206 : vector<2x32xf32>
    %208 = arith.mulf %35, %207 : vector<2x32xf32>
    %209 = math.tanh %208 : vector<2x32xf32>
    %210 = arith.mulf %202, %209 : vector<2x32xf32>
    %211 = arith.mulf %35, %210 : vector<2x32xf32>
    %212 = vector.extract_strided_slice %77 {offsets = [8, 0], sizes = [2, 128], strides = [1, 1]} : vector<16x256xf32> to vector<2x128xf32>
    %213 = vector.extract_strided_slice %77 {offsets = [6, 128], sizes = [2, 128], strides = [1, 1]} : vector<16x256xf32> to vector<2x128xf32>
    %214 = arith.addf %212, %213 : vector<2x128xf32>
    %215 = arith.truncf %211 : vector<2x32xf32> to vector<2x32xbf16>
    %cst_31 = arith.constant dense<0.000000e+00> : vector<2x128xf32>
    %216 = tpu.matmul %215, %71, %cst_31 {dimension_numbers = #tpu.dot_dimension_numbers<[1], [0], [0], [1], [0, 0, 1, 1], [], []>} : vector<2x32xbf16>, vector<32x128xbf16>, vector<2x128xf32> -> vector<2x128xf32>
    %217 = arith.addf %214, %216 : vector<2x128xf32>
    %218 = vector.extract_strided_slice %217 {offsets = [0, 0], sizes = [2, 32], strides = [1, 1]} : vector<2x128xf32> to vector<2x32xf32>
    %219 = arith.negf %218 : vector<2x32xf32>
    %220 = math.exp %219 : vector<2x32xf32>
    %cst_32 = arith.constant 1.000000e+00 : f32
    %221 = vector.broadcast %cst_32 : f32 to vector<2x32xf32>
    %222 = arith.addf %221, %220 : vector<2x32xf32>
    %223 = arith.divf %221, %222 : vector<2x32xf32>
    %224 = vector.extract_strided_slice %217 {offsets = [0, 32], sizes = [2, 32], strides = [1, 1]} : vector<2x128xf32> to vector<2x32xf32>
    %225 = arith.negf %224 : vector<2x32xf32>
    %226 = math.exp %225 : vector<2x32xf32>
    %cst_33 = arith.constant 1.000000e+00 : f32
    %227 = vector.broadcast %cst_33 : f32 to vector<2x32xf32>
    %228 = arith.addf %227, %226 : vector<2x32xf32>
    %229 = arith.divf %227, %228 : vector<2x32xf32>
    %230 = vector.extract_strided_slice %217 {offsets = [0, 64], sizes = [2, 32], strides = [1, 1]} : vector<2x128xf32> to vector<2x32xf32>
    %231 = arith.negf %230 : vector<2x32xf32>
    %232 = math.exp %231 : vector<2x32xf32>
    %cst_34 = arith.constant 1.000000e+00 : f32
    %233 = vector.broadcast %cst_34 : f32 to vector<2x32xf32>
    %234 = arith.addf %233, %232 : vector<2x32xf32>
    %235 = arith.divf %233, %234 : vector<2x32xf32>
    %236 = vector.extract_strided_slice %217 {offsets = [0, 96], sizes = [2, 32], strides = [1, 1]} : vector<2x128xf32> to vector<2x32xf32>
    %237 = math.tanh %236 : vector<2x32xf32>
    %238 = arith.mulf %229, %208 : vector<2x32xf32>
    %239 = arith.mulf %223, %237 : vector<2x32xf32>
    %240 = arith.addf %238, %239 : vector<2x32xf32>
    %241 = arith.mulf %42, %240 : vector<2x32xf32>
    %242 = math.tanh %241 : vector<2x32xf32>
    %243 = arith.mulf %235, %242 : vector<2x32xf32>
    %244 = arith.mulf %42, %243 : vector<2x32xf32>
    %245 = vector.extract_strided_slice %77 {offsets = [10, 0], sizes = [2, 128], strides = [1, 1]} : vector<16x256xf32> to vector<2x128xf32>
    %246 = vector.extract_strided_slice %77 {offsets = [4, 128], sizes = [2, 128], strides = [1, 1]} : vector<16x256xf32> to vector<2x128xf32>
    %247 = arith.addf %245, %246 : vector<2x128xf32>
    %248 = arith.truncf %244 : vector<2x32xf32> to vector<2x32xbf16>
    %cst_35 = arith.constant dense<0.000000e+00> : vector<2x128xf32>
    %249 = tpu.matmul %248, %71, %cst_35 {dimension_numbers = #tpu.dot_dimension_numbers<[1], [0], [0], [1], [0, 0, 1, 1], [], []>} : vector<2x32xbf16>, vector<32x128xbf16>, vector<2x128xf32> -> vector<2x128xf32>
    %250 = arith.addf %247, %249 : vector<2x128xf32>
    %251 = vector.extract_strided_slice %250 {offsets = [0, 0], sizes = [2, 32], strides = [1, 1]} : vector<2x128xf32> to vector<2x32xf32>
    %252 = arith.negf %251 : vector<2x32xf32>
    %253 = math.exp %252 : vector<2x32xf32>
    %cst_36 = arith.constant 1.000000e+00 : f32
    %254 = vector.broadcast %cst_36 : f32 to vector<2x32xf32>
    %255 = arith.addf %254, %253 : vector<2x32xf32>
    %256 = arith.divf %254, %255 : vector<2x32xf32>
    %257 = vector.extract_strided_slice %250 {offsets = [0, 32], sizes = [2, 32], strides = [1, 1]} : vector<2x128xf32> to vector<2x32xf32>
    %258 = arith.negf %257 : vector<2x32xf32>
    %259 = math.exp %258 : vector<2x32xf32>
    %cst_37 = arith.constant 1.000000e+00 : f32
    %260 = vector.broadcast %cst_37 : f32 to vector<2x32xf32>
    %261 = arith.addf %260, %259 : vector<2x32xf32>
    %262 = arith.divf %260, %261 : vector<2x32xf32>
    %263 = vector.extract_strided_slice %250 {offsets = [0, 64], sizes = [2, 32], strides = [1, 1]} : vector<2x128xf32> to vector<2x32xf32>
    %264 = arith.negf %263 : vector<2x32xf32>
    %265 = math.exp %264 : vector<2x32xf32>
    %cst_38 = arith.constant 1.000000e+00 : f32
    %266 = vector.broadcast %cst_38 : f32 to vector<2x32xf32>
    %267 = arith.addf %266, %265 : vector<2x32xf32>
    %268 = arith.divf %266, %267 : vector<2x32xf32>
    %269 = vector.extract_strided_slice %250 {offsets = [0, 96], sizes = [2, 32], strides = [1, 1]} : vector<2x128xf32> to vector<2x32xf32>
    %270 = math.tanh %269 : vector<2x32xf32>
    %271 = arith.mulf %262, %241 : vector<2x32xf32>
    %272 = arith.mulf %256, %270 : vector<2x32xf32>
    %273 = arith.addf %271, %272 : vector<2x32xf32>
    %274 = arith.mulf %49, %273 : vector<2x32xf32>
    %275 = math.tanh %274 : vector<2x32xf32>
    %276 = arith.mulf %268, %275 : vector<2x32xf32>
    %277 = arith.mulf %49, %276 : vector<2x32xf32>
    %278 = vector.extract_strided_slice %77 {offsets = [12, 0], sizes = [2, 128], strides = [1, 1]} : vector<16x256xf32> to vector<2x128xf32>
    %279 = vector.extract_strided_slice %77 {offsets = [2, 128], sizes = [2, 128], strides = [1, 1]} : vector<16x256xf32> to vector<2x128xf32>
    %280 = arith.addf %278, %279 : vector<2x128xf32>
    %281 = arith.truncf %277 : vector<2x32xf32> to vector<2x32xbf16>
    %cst_39 = arith.constant dense<0.000000e+00> : vector<2x128xf32>
    %282 = tpu.matmul %281, %71, %cst_39 {dimension_numbers = #tpu.dot_dimension_numbers<[1], [0], [0], [1], [0, 0, 1, 1], [], []>} : vector<2x32xbf16>, vector<32x128xbf16>, vector<2x128xf32> -> vector<2x128xf32>
    %283 = arith.addf %280, %282 : vector<2x128xf32>
    %284 = vector.extract_strided_slice %283 {offsets = [0, 0], sizes = [2, 32], strides = [1, 1]} : vector<2x128xf32> to vector<2x32xf32>
    %285 = arith.negf %284 : vector<2x32xf32>
    %286 = math.exp %285 : vector<2x32xf32>
    %cst_40 = arith.constant 1.000000e+00 : f32
    %287 = vector.broadcast %cst_40 : f32 to vector<2x32xf32>
    %288 = arith.addf %287, %286 : vector<2x32xf32>
    %289 = arith.divf %287, %288 : vector<2x32xf32>
    %290 = vector.extract_strided_slice %283 {offsets = [0, 32], sizes = [2, 32], strides = [1, 1]} : vector<2x128xf32> to vector<2x32xf32>
    %291 = arith.negf %290 : vector<2x32xf32>
    %292 = math.exp %291 : vector<2x32xf32>
    %cst_41 = arith.constant 1.000000e+00 : f32
    %293 = vector.broadcast %cst_41 : f32 to vector<2x32xf32>
    %294 = arith.addf %293, %292 : vector<2x32xf32>
    %295 = arith.divf %293, %294 : vector<2x32xf32>
    %296 = vector.extract_strided_slice %283 {offsets = [0, 64], sizes = [2, 32], strides = [1, 1]} : vector<2x128xf32> to vector<2x32xf32>
    %297 = arith.negf %296 : vector<2x32xf32>
    %298 = math.exp %297 : vector<2x32xf32>
    %cst_42 = arith.constant 1.000000e+00 : f32
    %299 = vector.broadcast %cst_42 : f32 to vector<2x32xf32>
    %300 = arith.addf %299, %298 : vector<2x32xf32>
    %301 = arith.divf %299, %300 : vector<2x32xf32>
    %302 = vector.extract_strided_slice %283 {offsets = [0, 96], sizes = [2, 32], strides = [1, 1]} : vector<2x128xf32> to vector<2x32xf32>
    %303 = math.tanh %302 : vector<2x32xf32>
    %304 = arith.mulf %295, %274 : vector<2x32xf32>
    %305 = arith.mulf %289, %303 : vector<2x32xf32>
    %306 = arith.addf %304, %305 : vector<2x32xf32>
    %307 = arith.mulf %56, %306 : vector<2x32xf32>
    %308 = math.tanh %307 : vector<2x32xf32>
    %309 = arith.mulf %301, %308 : vector<2x32xf32>
    %310 = arith.mulf %56, %309 : vector<2x32xf32>
    %311 = vector.extract_strided_slice %77 {offsets = [14, 0], sizes = [2, 128], strides = [1, 1]} : vector<16x256xf32> to vector<2x128xf32>
    %312 = vector.extract_strided_slice %77 {offsets = [0, 128], sizes = [2, 128], strides = [1, 1]} : vector<16x256xf32> to vector<2x128xf32>
    %313 = arith.addf %311, %312 : vector<2x128xf32>
    %314 = arith.truncf %310 : vector<2x32xf32> to vector<2x32xbf16>
    %cst_43 = arith.constant dense<0.000000e+00> : vector<2x128xf32>
    %315 = tpu.matmul %314, %71, %cst_43 {dimension_numbers = #tpu.dot_dimension_numbers<[1], [0], [0], [1], [0, 0, 1, 1], [], []>} : vector<2x32xbf16>, vector<32x128xbf16>, vector<2x128xf32> -> vector<2x128xf32>
    %316 = arith.addf %313, %315 : vector<2x128xf32>
    %317 = vector.extract_strided_slice %316 {offsets = [0, 0], sizes = [2, 32], strides = [1, 1]} : vector<2x128xf32> to vector<2x32xf32>
    %318 = arith.negf %317 : vector<2x32xf32>
    %319 = math.exp %318 : vector<2x32xf32>
    %cst_44 = arith.constant 1.000000e+00 : f32
    %320 = vector.broadcast %cst_44 : f32 to vector<2x32xf32>
    %321 = arith.addf %320, %319 : vector<2x32xf32>
    %322 = arith.divf %320, %321 : vector<2x32xf32>
    %323 = vector.extract_strided_slice %316 {offsets = [0, 32], sizes = [2, 32], strides = [1, 1]} : vector<2x128xf32> to vector<2x32xf32>
    %324 = arith.negf %323 : vector<2x32xf32>
    %325 = math.exp %324 : vector<2x32xf32>
    %cst_45 = arith.constant 1.000000e+00 : f32
    %326 = vector.broadcast %cst_45 : f32 to vector<2x32xf32>
    %327 = arith.addf %326, %325 : vector<2x32xf32>
    %328 = arith.divf %326, %327 : vector<2x32xf32>
    %329 = vector.extract_strided_slice %316 {offsets = [0, 64], sizes = [2, 32], strides = [1, 1]} : vector<2x128xf32> to vector<2x32xf32>
    %330 = arith.negf %329 : vector<2x32xf32>
    %331 = math.exp %330 : vector<2x32xf32>
    %cst_46 = arith.constant 1.000000e+00 : f32
    %332 = vector.broadcast %cst_46 : f32 to vector<2x32xf32>
    %333 = arith.addf %332, %331 : vector<2x32xf32>
    %334 = arith.divf %332, %333 : vector<2x32xf32>
    %335 = vector.extract_strided_slice %316 {offsets = [0, 96], sizes = [2, 32], strides = [1, 1]} : vector<2x128xf32> to vector<2x32xf32>
    %336 = math.tanh %335 : vector<2x32xf32>
    %337 = arith.mulf %328, %307 : vector<2x32xf32>
    %338 = arith.mulf %322, %336 : vector<2x32xf32>
    %339 = arith.addf %337, %338 : vector<2x32xf32>
    %340 = arith.mulf %63, %339 : vector<2x32xf32>
    %341 = math.tanh %340 : vector<2x32xf32>
    %342 = arith.mulf %334, %341 : vector<2x32xf32>
    %343 = arith.mulf %63, %342 : vector<2x32xf32>
    %344 = tpu.concatenate %112, %145, %178, %211, %244, %277, %310, %343 in 0 : vector<2x32xf32>, vector<2x32xf32>, vector<2x32xf32>, vector<2x32xf32>, vector<2x32xf32>, vector<2x32xf32>, vector<2x32xf32>, vector<2x32xf32> -> vector<16x32xf32>
    %345 = tpu.concatenate %343, %310, %277, %244, %211, %178, %145, %112 in 0 : vector<2x32xf32>, vector<2x32xf32>, vector<2x32xf32>, vector<2x32xf32>, vector<2x32xf32>, vector<2x32xf32>, vector<2x32xf32>, vector<2x32xf32> -> vector<16x32xf32>
    %346 = arith.select %66, %344, %345 : vector<16x32xi1>, vector<16x32xf32>
    %c1 = arith.constant 1 : index
    %c0_47 = arith.constant 0 : index
    %c0_48 = arith.constant 0 : index
    %347 = vector.load %arg3[%c1, %c0_47, %c0_48] : memref<2x32x256xbf16, #tpu.memory_space<vmem>>, vector<1x32x256xbf16>
    %348 = vector.shape_cast %347 : vector<1x32x256xbf16> to vector<32x256xbf16>
    %c1_49 = arith.constant 1 : index
    %c0_50 = arith.constant 0 : index
    %c0_51 = arith.constant 0 : index
    %349 = vector.load %arg4[%c1_49, %c0_50, %c0_51] : memref<2x32x128xbf16, #tpu.memory_space<vmem>>, vector<1x32x128xbf16>
    %350 = vector.shape_cast %349 : vector<1x32x128xbf16> to vector<32x128xbf16>
    %c1_52 = arith.constant 1 : index
    %c0_53 = arith.constant 0 : index
    %c0_54 = arith.constant 0 : index
    %351 = vector.load %arg5[%c1_52, %c0_53, %c0_54] : memref<2x1x256xf32, #tpu.memory_space<vmem>>, vector<1x1x256xf32>
    %352 = vector.shape_cast %351 : vector<1x1x256xf32> to vector<1x256xf32>
    %353 = arith.truncf %346 : vector<16x32xf32> to vector<16x32xbf16>
    %cst_55 = arith.constant dense<0.000000e+00> : vector<16x256xf32>
    %354 = tpu.matmul %353, %348, %cst_55 {dimension_numbers = #tpu.dot_dimension_numbers<[1], [0], [0], [1], [0, 0, 1, 1], [], []>} : vector<16x32xbf16>, vector<32x256xbf16>, vector<16x256xf32> -> vector<16x256xf32>
    %355 = vector.broadcast %352 : vector<1x256xf32> to vector<16x256xf32>
    %356 = arith.addf %354, %355 : vector<16x256xf32>
    %cst_56 = arith.constant 0.000000e+00 : f32
    %357 = vector.broadcast %cst_56 : f32 to vector<2x32xf32>
    %cst_57 = arith.constant 0.000000e+00 : f32
    %358 = vector.broadcast %cst_57 : f32 to vector<2x32xf32>
    %359 = vector.extract_strided_slice %356 {offsets = [0, 0], sizes = [2, 128], strides = [1, 1]} : vector<16x256xf32> to vector<2x128xf32>
    %360 = vector.extract_strided_slice %356 {offsets = [14, 128], sizes = [2, 128], strides = [1, 1]} : vector<16x256xf32> to vector<2x128xf32>
    %361 = arith.addf %359, %360 : vector<2x128xf32>
    %362 = arith.truncf %357 : vector<2x32xf32> to vector<2x32xbf16>
    %cst_58 = arith.constant dense<0.000000e+00> : vector<2x128xf32>
    %363 = tpu.matmul %362, %350, %cst_58 {dimension_numbers = #tpu.dot_dimension_numbers<[1], [0], [0], [1], [0, 0, 1, 1], [], []>} : vector<2x32xbf16>, vector<32x128xbf16>, vector<2x128xf32> -> vector<2x128xf32>
    %364 = arith.addf %361, %363 : vector<2x128xf32>
    %365 = vector.extract_strided_slice %364 {offsets = [0, 0], sizes = [2, 32], strides = [1, 1]} : vector<2x128xf32> to vector<2x32xf32>
    %366 = arith.negf %365 : vector<2x32xf32>
    %367 = math.exp %366 : vector<2x32xf32>
    %cst_59 = arith.constant 1.000000e+00 : f32
    %368 = vector.broadcast %cst_59 : f32 to vector<2x32xf32>
    %369 = arith.addf %368, %367 : vector<2x32xf32>
    %370 = arith.divf %368, %369 : vector<2x32xf32>
    %371 = vector.extract_strided_slice %364 {offsets = [0, 32], sizes = [2, 32], strides = [1, 1]} : vector<2x128xf32> to vector<2x32xf32>
    %372 = arith.negf %371 : vector<2x32xf32>
    %373 = math.exp %372 : vector<2x32xf32>
    %cst_60 = arith.constant 1.000000e+00 : f32
    %374 = vector.broadcast %cst_60 : f32 to vector<2x32xf32>
    %375 = arith.addf %374, %373 : vector<2x32xf32>
    %376 = arith.divf %374, %375 : vector<2x32xf32>
    %377 = vector.extract_strided_slice %364 {offsets = [0, 64], sizes = [2, 32], strides = [1, 1]} : vector<2x128xf32> to vector<2x32xf32>
    %378 = arith.negf %377 : vector<2x32xf32>
    %379 = math.exp %378 : vector<2x32xf32>
    %cst_61 = arith.constant 1.000000e+00 : f32
    %380 = vector.broadcast %cst_61 : f32 to vector<2x32xf32>
    %381 = arith.addf %380, %379 : vector<2x32xf32>
    %382 = arith.divf %380, %381 : vector<2x32xf32>
    %383 = vector.extract_strided_slice %364 {offsets = [0, 96], sizes = [2, 32], strides = [1, 1]} : vector<2x128xf32> to vector<2x32xf32>
    %384 = math.tanh %383 : vector<2x32xf32>
    %385 = arith.mulf %376, %358 : vector<2x32xf32>
    %386 = arith.mulf %370, %384 : vector<2x32xf32>
    %387 = arith.addf %385, %386 : vector<2x32xf32>
    %388 = arith.mulf %14, %387 : vector<2x32xf32>
    %389 = math.tanh %388 : vector<2x32xf32>
    %390 = arith.mulf %382, %389 : vector<2x32xf32>
    %391 = arith.mulf %14, %390 : vector<2x32xf32>
    %392 = vector.extract_strided_slice %356 {offsets = [2, 0], sizes = [2, 128], strides = [1, 1]} : vector<16x256xf32> to vector<2x128xf32>
    %393 = vector.extract_strided_slice %356 {offsets = [12, 128], sizes = [2, 128], strides = [1, 1]} : vector<16x256xf32> to vector<2x128xf32>
    %394 = arith.addf %392, %393 : vector<2x128xf32>
    %395 = arith.truncf %391 : vector<2x32xf32> to vector<2x32xbf16>
    %cst_62 = arith.constant dense<0.000000e+00> : vector<2x128xf32>
    %396 = tpu.matmul %395, %350, %cst_62 {dimension_numbers = #tpu.dot_dimension_numbers<[1], [0], [0], [1], [0, 0, 1, 1], [], []>} : vector<2x32xbf16>, vector<32x128xbf16>, vector<2x128xf32> -> vector<2x128xf32>
    %397 = arith.addf %394, %396 : vector<2x128xf32>
    %398 = vector.extract_strided_slice %397 {offsets = [0, 0], sizes = [2, 32], strides = [1, 1]} : vector<2x128xf32> to vector<2x32xf32>
    %399 = arith.negf %398 : vector<2x32xf32>
    %400 = math.exp %399 : vector<2x32xf32>
    %cst_63 = arith.constant 1.000000e+00 : f32
    %401 = vector.broadcast %cst_63 : f32 to vector<2x32xf32>
    %402 = arith.addf %401, %400 : vector<2x32xf32>
    %403 = arith.divf %401, %402 : vector<2x32xf32>
    %404 = vector.extract_strided_slice %397 {offsets = [0, 32], sizes = [2, 32], strides = [1, 1]} : vector<2x128xf32> to vector<2x32xf32>
    %405 = arith.negf %404 : vector<2x32xf32>
    %406 = math.exp %405 : vector<2x32xf32>
    %cst_64 = arith.constant 1.000000e+00 : f32
    %407 = vector.broadcast %cst_64 : f32 to vector<2x32xf32>
    %408 = arith.addf %407, %406 : vector<2x32xf32>
    %409 = arith.divf %407, %408 : vector<2x32xf32>
    %410 = vector.extract_strided_slice %397 {offsets = [0, 64], sizes = [2, 32], strides = [1, 1]} : vector<2x128xf32> to vector<2x32xf32>
    %411 = arith.negf %410 : vector<2x32xf32>
    %412 = math.exp %411 : vector<2x32xf32>
    %cst_65 = arith.constant 1.000000e+00 : f32
    %413 = vector.broadcast %cst_65 : f32 to vector<2x32xf32>
    %414 = arith.addf %413, %412 : vector<2x32xf32>
    %415 = arith.divf %413, %414 : vector<2x32xf32>
    %416 = vector.extract_strided_slice %397 {offsets = [0, 96], sizes = [2, 32], strides = [1, 1]} : vector<2x128xf32> to vector<2x32xf32>
    %417 = math.tanh %416 : vector<2x32xf32>
    %418 = arith.mulf %409, %388 : vector<2x32xf32>
    %419 = arith.mulf %403, %417 : vector<2x32xf32>
    %420 = arith.addf %418, %419 : vector<2x32xf32>
    %421 = arith.mulf %21, %420 : vector<2x32xf32>
    %422 = math.tanh %421 : vector<2x32xf32>
    %423 = arith.mulf %415, %422 : vector<2x32xf32>
    %424 = arith.mulf %21, %423 : vector<2x32xf32>
    %425 = vector.extract_strided_slice %356 {offsets = [4, 0], sizes = [2, 128], strides = [1, 1]} : vector<16x256xf32> to vector<2x128xf32>
    %426 = vector.extract_strided_slice %356 {offsets = [10, 128], sizes = [2, 128], strides = [1, 1]} : vector<16x256xf32> to vector<2x128xf32>
    %427 = arith.addf %425, %426 : vector<2x128xf32>
    %428 = arith.truncf %424 : vector<2x32xf32> to vector<2x32xbf16>
    %cst_66 = arith.constant dense<0.000000e+00> : vector<2x128xf32>
    %429 = tpu.matmul %428, %350, %cst_66 {dimension_numbers = #tpu.dot_dimension_numbers<[1], [0], [0], [1], [0, 0, 1, 1], [], []>} : vector<2x32xbf16>, vector<32x128xbf16>, vector<2x128xf32> -> vector<2x128xf32>
    %430 = arith.addf %427, %429 : vector<2x128xf32>
    %431 = vector.extract_strided_slice %430 {offsets = [0, 0], sizes = [2, 32], strides = [1, 1]} : vector<2x128xf32> to vector<2x32xf32>
    %432 = arith.negf %431 : vector<2x32xf32>
    %433 = math.exp %432 : vector<2x32xf32>
    %cst_67 = arith.constant 1.000000e+00 : f32
    %434 = vector.broadcast %cst_67 : f32 to vector<2x32xf32>
    %435 = arith.addf %434, %433 : vector<2x32xf32>
    %436 = arith.divf %434, %435 : vector<2x32xf32>
    %437 = vector.extract_strided_slice %430 {offsets = [0, 32], sizes = [2, 32], strides = [1, 1]} : vector<2x128xf32> to vector<2x32xf32>
    %438 = arith.negf %437 : vector<2x32xf32>
    %439 = math.exp %438 : vector<2x32xf32>
    %cst_68 = arith.constant 1.000000e+00 : f32
    %440 = vector.broadcast %cst_68 : f32 to vector<2x32xf32>
    %441 = arith.addf %440, %439 : vector<2x32xf32>
    %442 = arith.divf %440, %441 : vector<2x32xf32>
    %443 = vector.extract_strided_slice %430 {offsets = [0, 64], sizes = [2, 32], strides = [1, 1]} : vector<2x128xf32> to vector<2x32xf32>
    %444 = arith.negf %443 : vector<2x32xf32>
    %445 = math.exp %444 : vector<2x32xf32>
    %cst_69 = arith.constant 1.000000e+00 : f32
    %446 = vector.broadcast %cst_69 : f32 to vector<2x32xf32>
    %447 = arith.addf %446, %445 : vector<2x32xf32>
    %448 = arith.divf %446, %447 : vector<2x32xf32>
    %449 = vector.extract_strided_slice %430 {offsets = [0, 96], sizes = [2, 32], strides = [1, 1]} : vector<2x128xf32> to vector<2x32xf32>
    %450 = math.tanh %449 : vector<2x32xf32>
    %451 = arith.mulf %442, %421 : vector<2x32xf32>
    %452 = arith.mulf %436, %450 : vector<2x32xf32>
    %453 = arith.addf %451, %452 : vector<2x32xf32>
    %454 = arith.mulf %28, %453 : vector<2x32xf32>
    %455 = math.tanh %454 : vector<2x32xf32>
    %456 = arith.mulf %448, %455 : vector<2x32xf32>
    %457 = arith.mulf %28, %456 : vector<2x32xf32>
    %458 = vector.extract_strided_slice %356 {offsets = [6, 0], sizes = [2, 128], strides = [1, 1]} : vector<16x256xf32> to vector<2x128xf32>
    %459 = vector.extract_strided_slice %356 {offsets = [8, 128], sizes = [2, 128], strides = [1, 1]} : vector<16x256xf32> to vector<2x128xf32>
    %460 = arith.addf %458, %459 : vector<2x128xf32>
    %461 = arith.truncf %457 : vector<2x32xf32> to vector<2x32xbf16>
    %cst_70 = arith.constant dense<0.000000e+00> : vector<2x128xf32>
    %462 = tpu.matmul %461, %350, %cst_70 {dimension_numbers = #tpu.dot_dimension_numbers<[1], [0], [0], [1], [0, 0, 1, 1], [], []>} : vector<2x32xbf16>, vector<32x128xbf16>, vector<2x128xf32> -> vector<2x128xf32>
    %463 = arith.addf %460, %462 : vector<2x128xf32>
    %464 = vector.extract_strided_slice %463 {offsets = [0, 0], sizes = [2, 32], strides = [1, 1]} : vector<2x128xf32> to vector<2x32xf32>
    %465 = arith.negf %464 : vector<2x32xf32>
    %466 = math.exp %465 : vector<2x32xf32>
    %cst_71 = arith.constant 1.000000e+00 : f32
    %467 = vector.broadcast %cst_71 : f32 to vector<2x32xf32>
    %468 = arith.addf %467, %466 : vector<2x32xf32>
    %469 = arith.divf %467, %468 : vector<2x32xf32>
    %470 = vector.extract_strided_slice %463 {offsets = [0, 32], sizes = [2, 32], strides = [1, 1]} : vector<2x128xf32> to vector<2x32xf32>
    %471 = arith.negf %470 : vector<2x32xf32>
    %472 = math.exp %471 : vector<2x32xf32>
    %cst_72 = arith.constant 1.000000e+00 : f32
    %473 = vector.broadcast %cst_72 : f32 to vector<2x32xf32>
    %474 = arith.addf %473, %472 : vector<2x32xf32>
    %475 = arith.divf %473, %474 : vector<2x32xf32>
    %476 = vector.extract_strided_slice %463 {offsets = [0, 64], sizes = [2, 32], strides = [1, 1]} : vector<2x128xf32> to vector<2x32xf32>
    %477 = arith.negf %476 : vector<2x32xf32>
    %478 = math.exp %477 : vector<2x32xf32>
    %cst_73 = arith.constant 1.000000e+00 : f32
    %479 = vector.broadcast %cst_73 : f32 to vector<2x32xf32>
    %480 = arith.addf %479, %478 : vector<2x32xf32>
    %481 = arith.divf %479, %480 : vector<2x32xf32>
    %482 = vector.extract_strided_slice %463 {offsets = [0, 96], sizes = [2, 32], strides = [1, 1]} : vector<2x128xf32> to vector<2x32xf32>
    %483 = math.tanh %482 : vector<2x32xf32>
    %484 = arith.mulf %475, %454 : vector<2x32xf32>
    %485 = arith.mulf %469, %483 : vector<2x32xf32>
    %486 = arith.addf %484, %485 : vector<2x32xf32>
    %487 = arith.mulf %35, %486 : vector<2x32xf32>
    %488 = math.tanh %487 : vector<2x32xf32>
    %489 = arith.mulf %481, %488 : vector<2x32xf32>
    %490 = arith.mulf %35, %489 : vector<2x32xf32>
    %491 = vector.extract_strided_slice %356 {offsets = [8, 0], sizes = [2, 128], strides = [1, 1]} : vector<16x256xf32> to vector<2x128xf32>
    %492 = vector.extract_strided_slice %356 {offsets = [6, 128], sizes = [2, 128], strides = [1, 1]} : vector<16x256xf32> to vector<2x128xf32>
    %493 = arith.addf %491, %492 : vector<2x128xf32>
    %494 = arith.truncf %490 : vector<2x32xf32> to vector<2x32xbf16>
    %cst_74 = arith.constant dense<0.000000e+00> : vector<2x128xf32>
    %495 = tpu.matmul %494, %350, %cst_74 {dimension_numbers = #tpu.dot_dimension_numbers<[1], [0], [0], [1], [0, 0, 1, 1], [], []>} : vector<2x32xbf16>, vector<32x128xbf16>, vector<2x128xf32> -> vector<2x128xf32>
    %496 = arith.addf %493, %495 : vector<2x128xf32>
    %497 = vector.extract_strided_slice %496 {offsets = [0, 0], sizes = [2, 32], strides = [1, 1]} : vector<2x128xf32> to vector<2x32xf32>
    %498 = arith.negf %497 : vector<2x32xf32>
    %499 = math.exp %498 : vector<2x32xf32>
    %cst_75 = arith.constant 1.000000e+00 : f32
    %500 = vector.broadcast %cst_75 : f32 to vector<2x32xf32>
    %501 = arith.addf %500, %499 : vector<2x32xf32>
    %502 = arith.divf %500, %501 : vector<2x32xf32>
    %503 = vector.extract_strided_slice %496 {offsets = [0, 32], sizes = [2, 32], strides = [1, 1]} : vector<2x128xf32> to vector<2x32xf32>
    %504 = arith.negf %503 : vector<2x32xf32>
    %505 = math.exp %504 : vector<2x32xf32>
    %cst_76 = arith.constant 1.000000e+00 : f32
    %506 = vector.broadcast %cst_76 : f32 to vector<2x32xf32>
    %507 = arith.addf %506, %505 : vector<2x32xf32>
    %508 = arith.divf %506, %507 : vector<2x32xf32>
    %509 = vector.extract_strided_slice %496 {offsets = [0, 64], sizes = [2, 32], strides = [1, 1]} : vector<2x128xf32> to vector<2x32xf32>
    %510 = arith.negf %509 : vector<2x32xf32>
    %511 = math.exp %510 : vector<2x32xf32>
    %cst_77 = arith.constant 1.000000e+00 : f32
    %512 = vector.broadcast %cst_77 : f32 to vector<2x32xf32>
    %513 = arith.addf %512, %511 : vector<2x32xf32>
    %514 = arith.divf %512, %513 : vector<2x32xf32>
    %515 = vector.extract_strided_slice %496 {offsets = [0, 96], sizes = [2, 32], strides = [1, 1]} : vector<2x128xf32> to vector<2x32xf32>
    %516 = math.tanh %515 : vector<2x32xf32>
    %517 = arith.mulf %508, %487 : vector<2x32xf32>
    %518 = arith.mulf %502, %516 : vector<2x32xf32>
    %519 = arith.addf %517, %518 : vector<2x32xf32>
    %520 = arith.mulf %42, %519 : vector<2x32xf32>
    %521 = math.tanh %520 : vector<2x32xf32>
    %522 = arith.mulf %514, %521 : vector<2x32xf32>
    %523 = arith.mulf %42, %522 : vector<2x32xf32>
    %524 = vector.extract_strided_slice %356 {offsets = [10, 0], sizes = [2, 128], strides = [1, 1]} : vector<16x256xf32> to vector<2x128xf32>
    %525 = vector.extract_strided_slice %356 {offsets = [4, 128], sizes = [2, 128], strides = [1, 1]} : vector<16x256xf32> to vector<2x128xf32>
    %526 = arith.addf %524, %525 : vector<2x128xf32>
    %527 = arith.truncf %523 : vector<2x32xf32> to vector<2x32xbf16>
    %cst_78 = arith.constant dense<0.000000e+00> : vector<2x128xf32>
    %528 = tpu.matmul %527, %350, %cst_78 {dimension_numbers = #tpu.dot_dimension_numbers<[1], [0], [0], [1], [0, 0, 1, 1], [], []>} : vector<2x32xbf16>, vector<32x128xbf16>, vector<2x128xf32> -> vector<2x128xf32>
    %529 = arith.addf %526, %528 : vector<2x128xf32>
    %530 = vector.extract_strided_slice %529 {offsets = [0, 0], sizes = [2, 32], strides = [1, 1]} : vector<2x128xf32> to vector<2x32xf32>
    %531 = arith.negf %530 : vector<2x32xf32>
    %532 = math.exp %531 : vector<2x32xf32>
    %cst_79 = arith.constant 1.000000e+00 : f32
    %533 = vector.broadcast %cst_79 : f32 to vector<2x32xf32>
    %534 = arith.addf %533, %532 : vector<2x32xf32>
    %535 = arith.divf %533, %534 : vector<2x32xf32>
    %536 = vector.extract_strided_slice %529 {offsets = [0, 32], sizes = [2, 32], strides = [1, 1]} : vector<2x128xf32> to vector<2x32xf32>
    %537 = arith.negf %536 : vector<2x32xf32>
    %538 = math.exp %537 : vector<2x32xf32>
    %cst_80 = arith.constant 1.000000e+00 : f32
    %539 = vector.broadcast %cst_80 : f32 to vector<2x32xf32>
    %540 = arith.addf %539, %538 : vector<2x32xf32>
    %541 = arith.divf %539, %540 : vector<2x32xf32>
    %542 = vector.extract_strided_slice %529 {offsets = [0, 64], sizes = [2, 32], strides = [1, 1]} : vector<2x128xf32> to vector<2x32xf32>
    %543 = arith.negf %542 : vector<2x32xf32>
    %544 = math.exp %543 : vector<2x32xf32>
    %cst_81 = arith.constant 1.000000e+00 : f32
    %545 = vector.broadcast %cst_81 : f32 to vector<2x32xf32>
    %546 = arith.addf %545, %544 : vector<2x32xf32>
    %547 = arith.divf %545, %546 : vector<2x32xf32>
    %548 = vector.extract_strided_slice %529 {offsets = [0, 96], sizes = [2, 32], strides = [1, 1]} : vector<2x128xf32> to vector<2x32xf32>
    %549 = math.tanh %548 : vector<2x32xf32>
    %550 = arith.mulf %541, %520 : vector<2x32xf32>
    %551 = arith.mulf %535, %549 : vector<2x32xf32>
    %552 = arith.addf %550, %551 : vector<2x32xf32>
    %553 = arith.mulf %49, %552 : vector<2x32xf32>
    %554 = math.tanh %553 : vector<2x32xf32>
    %555 = arith.mulf %547, %554 : vector<2x32xf32>
    %556 = arith.mulf %49, %555 : vector<2x32xf32>
    %557 = vector.extract_strided_slice %356 {offsets = [12, 0], sizes = [2, 128], strides = [1, 1]} : vector<16x256xf32> to vector<2x128xf32>
    %558 = vector.extract_strided_slice %356 {offsets = [2, 128], sizes = [2, 128], strides = [1, 1]} : vector<16x256xf32> to vector<2x128xf32>
    %559 = arith.addf %557, %558 : vector<2x128xf32>
    %560 = arith.truncf %556 : vector<2x32xf32> to vector<2x32xbf16>
    %cst_82 = arith.constant dense<0.000000e+00> : vector<2x128xf32>
    %561 = tpu.matmul %560, %350, %cst_82 {dimension_numbers = #tpu.dot_dimension_numbers<[1], [0], [0], [1], [0, 0, 1, 1], [], []>} : vector<2x32xbf16>, vector<32x128xbf16>, vector<2x128xf32> -> vector<2x128xf32>
    %562 = arith.addf %559, %561 : vector<2x128xf32>
    %563 = vector.extract_strided_slice %562 {offsets = [0, 0], sizes = [2, 32], strides = [1, 1]} : vector<2x128xf32> to vector<2x32xf32>
    %564 = arith.negf %563 : vector<2x32xf32>
    %565 = math.exp %564 : vector<2x32xf32>
    %cst_83 = arith.constant 1.000000e+00 : f32
    %566 = vector.broadcast %cst_83 : f32 to vector<2x32xf32>
    %567 = arith.addf %566, %565 : vector<2x32xf32>
    %568 = arith.divf %566, %567 : vector<2x32xf32>
    %569 = vector.extract_strided_slice %562 {offsets = [0, 32], sizes = [2, 32], strides = [1, 1]} : vector<2x128xf32> to vector<2x32xf32>
    %570 = arith.negf %569 : vector<2x32xf32>
    %571 = math.exp %570 : vector<2x32xf32>
    %cst_84 = arith.constant 1.000000e+00 : f32
    %572 = vector.broadcast %cst_84 : f32 to vector<2x32xf32>
    %573 = arith.addf %572, %571 : vector<2x32xf32>
    %574 = arith.divf %572, %573 : vector<2x32xf32>
    %575 = vector.extract_strided_slice %562 {offsets = [0, 64], sizes = [2, 32], strides = [1, 1]} : vector<2x128xf32> to vector<2x32xf32>
    %576 = arith.negf %575 : vector<2x32xf32>
    %577 = math.exp %576 : vector<2x32xf32>
    %cst_85 = arith.constant 1.000000e+00 : f32
    %578 = vector.broadcast %cst_85 : f32 to vector<2x32xf32>
    %579 = arith.addf %578, %577 : vector<2x32xf32>
    %580 = arith.divf %578, %579 : vector<2x32xf32>
    %581 = vector.extract_strided_slice %562 {offsets = [0, 96], sizes = [2, 32], strides = [1, 1]} : vector<2x128xf32> to vector<2x32xf32>
    %582 = math.tanh %581 : vector<2x32xf32>
    %583 = arith.mulf %574, %553 : vector<2x32xf32>
    %584 = arith.mulf %568, %582 : vector<2x32xf32>
    %585 = arith.addf %583, %584 : vector<2x32xf32>
    %586 = arith.mulf %56, %585 : vector<2x32xf32>
    %587 = math.tanh %586 : vector<2x32xf32>
    %588 = arith.mulf %580, %587 : vector<2x32xf32>
    %589 = arith.mulf %56, %588 : vector<2x32xf32>
    %590 = vector.extract_strided_slice %356 {offsets = [14, 0], sizes = [2, 128], strides = [1, 1]} : vector<16x256xf32> to vector<2x128xf32>
    %591 = vector.extract_strided_slice %356 {offsets = [0, 128], sizes = [2, 128], strides = [1, 1]} : vector<16x256xf32> to vector<2x128xf32>
    %592 = arith.addf %590, %591 : vector<2x128xf32>
    %593 = arith.truncf %589 : vector<2x32xf32> to vector<2x32xbf16>
    %cst_86 = arith.constant dense<0.000000e+00> : vector<2x128xf32>
    %594 = tpu.matmul %593, %350, %cst_86 {dimension_numbers = #tpu.dot_dimension_numbers<[1], [0], [0], [1], [0, 0, 1, 1], [], []>} : vector<2x32xbf16>, vector<32x128xbf16>, vector<2x128xf32> -> vector<2x128xf32>
    %595 = arith.addf %592, %594 : vector<2x128xf32>
    %596 = vector.extract_strided_slice %595 {offsets = [0, 0], sizes = [2, 32], strides = [1, 1]} : vector<2x128xf32> to vector<2x32xf32>
    %597 = arith.negf %596 : vector<2x32xf32>
    %598 = math.exp %597 : vector<2x32xf32>
    %cst_87 = arith.constant 1.000000e+00 : f32
    %599 = vector.broadcast %cst_87 : f32 to vector<2x32xf32>
    %600 = arith.addf %599, %598 : vector<2x32xf32>
    %601 = arith.divf %599, %600 : vector<2x32xf32>
    %602 = vector.extract_strided_slice %595 {offsets = [0, 32], sizes = [2, 32], strides = [1, 1]} : vector<2x128xf32> to vector<2x32xf32>
    %603 = arith.negf %602 : vector<2x32xf32>
    %604 = math.exp %603 : vector<2x32xf32>
    %cst_88 = arith.constant 1.000000e+00 : f32
    %605 = vector.broadcast %cst_88 : f32 to vector<2x32xf32>
    %606 = arith.addf %605, %604 : vector<2x32xf32>
    %607 = arith.divf %605, %606 : vector<2x32xf32>
    %608 = vector.extract_strided_slice %595 {offsets = [0, 64], sizes = [2, 32], strides = [1, 1]} : vector<2x128xf32> to vector<2x32xf32>
    %609 = arith.negf %608 : vector<2x32xf32>
    %610 = math.exp %609 : vector<2x32xf32>
    %cst_89 = arith.constant 1.000000e+00 : f32
    %611 = vector.broadcast %cst_89 : f32 to vector<2x32xf32>
    %612 = arith.addf %611, %610 : vector<2x32xf32>
    %613 = arith.divf %611, %612 : vector<2x32xf32>
    %614 = vector.extract_strided_slice %595 {offsets = [0, 96], sizes = [2, 32], strides = [1, 1]} : vector<2x128xf32> to vector<2x32xf32>
    %615 = math.tanh %614 : vector<2x32xf32>
    %616 = arith.mulf %607, %586 : vector<2x32xf32>
    %617 = arith.mulf %601, %615 : vector<2x32xf32>
    %618 = arith.addf %616, %617 : vector<2x32xf32>
    %619 = arith.mulf %63, %618 : vector<2x32xf32>
    %620 = math.tanh %619 : vector<2x32xf32>
    %621 = arith.mulf %613, %620 : vector<2x32xf32>
    %622 = arith.mulf %63, %621 : vector<2x32xf32>
    %623 = tpu.concatenate %391, %424, %457, %490, %523, %556, %589, %622 in 0 : vector<2x32xf32>, vector<2x32xf32>, vector<2x32xf32>, vector<2x32xf32>, vector<2x32xf32>, vector<2x32xf32>, vector<2x32xf32>, vector<2x32xf32> -> vector<16x32xf32>
    %624 = tpu.concatenate %622, %589, %556, %523, %490, %457, %424, %391 in 0 : vector<2x32xf32>, vector<2x32xf32>, vector<2x32xf32>, vector<2x32xf32>, vector<2x32xf32>, vector<2x32xf32>, vector<2x32xf32>, vector<2x32xf32> -> vector<16x32xf32>
    %625 = arith.select %66, %623, %624 : vector<16x32xi1>, vector<16x32xf32>
    %626 = arith.truncf %625 : vector<16x32xf32> to vector<16x32xbf16>
    %c0_90 = arith.constant 0 : index
    %c0_91 = arith.constant 0 : index
    %627 = vector.load %arg6[%c0_90, %c0_91] : memref<32x32xbf16, #tpu.memory_space<vmem>>, vector<32x32xbf16>
    %cst_92 = arith.constant dense<0.000000e+00> : vector<16x32xf32>
    %628 = tpu.matmul %626, %627, %cst_92 {dimension_numbers = #tpu.dot_dimension_numbers<[1], [0], [0], [1], [0, 0, 1, 1], [], []>} : vector<16x32xbf16>, vector<32x32xbf16>, vector<16x32xf32> -> vector<16x32xf32>
    %c0_93 = arith.constant 0 : index
    %c0_94 = arith.constant 0 : index
    %629 = vector.load %arg7[%c0_93, %c0_94] : memref<1x32xf32, #tpu.memory_space<vmem>>, vector<1x32xf32>
    %630 = vector.broadcast %629 : vector<1x32xf32> to vector<16x32xf32>
    %631 = arith.addf %628, %630 : vector<16x32xf32>
    %c0_95 = arith.constant 0 : index
    %c0_96 = arith.constant 0 : index
    %632 = vector.load %arg1[%c0_95, %c0_96] : memref<16x1xi32, #tpu.memory_space<vmem>>, vector<16x1xi32>
    %c0_i32_97 = arith.constant 0 : i32
    %633 = vector.broadcast %c0_i32_97 : i32 to vector<16x1xi32>
    %634 = arith.cmpi ne, %632, %633 : vector<16x1xi32>
    %c0_98 = arith.constant 0 : index
    %c0_99 = arith.constant 0 : index
    %635 = vector.load %arg0[%c0_98, %c0_99] : memref<16x1xi32, #tpu.memory_space<vmem>>, vector<16x1xi32>
    %c5_i32 = arith.constant 5 : i32
    %636 = vector.broadcast %c5_i32 : i32 to vector<16x1xi32>
    %637 = arith.cmpi eq, %635, %636 : vector<16x1xi32>
    %638 = arith.ori %634, %637 : vector<16x1xi1>
    %639 = vector.shape_cast %638 : vector<16x1xi1> to vector<16x1xi1>
    %640 = vector.broadcast %639 : vector<16x1xi1> to vector<16x32xi1>
    %c0_100 = arith.constant 0 : index
    %c0_101 = arith.constant 0 : index
    %641 = vector.load %arg2[%c0_100, %c0_101] : memref<16x32xf32, #tpu.memory_space<vmem>>, vector<16x32xf32>
    %642 = arith.select %640, %641, %631 : vector<16x32xi1>, vector<16x32xf32>
    %c0_102 = arith.constant 0 : index
    %c0_103 = arith.constant 0 : index
    %643 = vector.load %arg8[%c0_102, %c0_103] : memref<16x32xf32, #tpu.memory_space<vmem>>, vector<16x32xf32>
    tpu.vector_store %arg8[%c0_102, %c0_103], %642 {strides = array<i32>} : memref<16x32xf32, #tpu.memory_space<vmem>>, vector<16x32xf32>,
    return
  }
}

</mosaic_0001>

<bundles_post_ra>
// kernel: tpu_custom_call.1
= control target key start
LH: loop header
LB: loop body
LE: loop exit
PB: predicated region body
PF: predicated region fallthrough
CT: control target
= control target key end

     0   :  { %13 = vsyncpa [#allocation3], 0  ;;  %s2968_s0 = inlined_call_operand.vmem [shape: s32[16,1], index: 0, kind: input, shape index: {}]   ;;  %s2969_s1 = inlined_call_operand.vmem [shape: s32[16,1], index: 1, kind: input, shape index: {}]   ;;  %s2970_s2 = inlined_call_operand.vmem [shape: f32[16,32], index: 2, kind: input, shape index: {}]   ;;  %s2971_s3 = inlined_call_operand.hbm [shape: bf16[2,32,256], index: 3, kind: input, shape index: {}]   ;;  %s2972_s4 = inlined_call_operand.vmem [shape: bf16[2,32,128], index: 4, kind: input, shape index: {}]   ;;  %s2973_s5 = inlined_call_operand.vmem [shape: f32[2,1,256], index: 5, kind: input, shape index: {}]   ;;  %s2974_s6 = inlined_call_operand.hbm [shape: bf16[32,32], index: 6, kind: input, shape index: {}]   ;;  %s2975_s7 = inlined_call_operand.vmem [shape: f32[1,32], index: 7, kind: input, shape index: {}]   ;;  %s2976_s8 = inlined_call_operand.hbm [shape: f32[16,32], index: 8, kind: output, shape index: {}]  }
   0x1   :  { %14 = vsyncpa [#allocation6], 0 }
   0x2   :  { %15 = vsyncpa [#allocation4], 0  ;;  %s2374_s27 = smov [#allocation2]   ;;  %s2302_s9 = scalar_lea.hbm %s2971_s3, 1024 }
   0x3   :  { %s27_s28 = sshll.u32 %s2374_s27, 4  ;;  %p2303_p0 = scmp.ne.s32.totalorder %s2971_s3, %s2302_s9  ;;  %s28_s28 = int_to_ptr.vmem [resolvable:$true] %s27_s28 }
   0x4   :  { %p2306_p1 = scmp.lt.u32.totalorder %s2302_s9, %s2971_s3 }
   0x6   :  { %p2308_p2 = pnand %p2306_p1, %p2303_p0 }
   0x8   :  { %2311 = shalt.err (!%p2308_p2)
}
   0x9   :  { %s2312_s14 = scalar_lea.vmem %s28_s28, 1024  ;;  %p2317_p4 = scmp.lt.s32.totalorder %s28_s28, %s28_s28 }
   0xa   :  { %p2313_p3 = scmp.ne.s32.totalorder %s28_s28, %s2312_s14  ;;  %p2318_p5 = scmp.lt.s32.totalorder %s2312_s14, %s2312_s14 }
   0xc   :  { %p2319_p6 = por %p2318_p5, %p2317_p4 }
   0xe   :  { %p2320_p7 = pnand %p2319_p6, %p2313_p3 }
  0x10   :  { %2323 = shalt.err (!%p2320_p7)
}
  0x11   :  { %s2375_s15 = smov 128   ;;  %s2376_s16 = smov 8  }
  0x12   :  { %33 = dma.hbm_to_vmem [thread:$0]  %s2971_s3, 1024, %s28_s28, [#allocation3], %s2375_s15, %s2375_s15, %s2376_s16  }
  0x13   :  { %s2377_s19 = smov [#allocation5]   ;;  %s2324_s23 = scalar_lea.hbm %s2974_s6, 256 }
  0x14   :  { %s43_s20 = sshll.u32 %s2377_s19, 4  ;;  %p2325_p8 = scmp.ne.s32.totalorder %s2974_s6, %s2324_s23  ;;  %s44_s20 = int_to_ptr.vmem [resolvable:$true] %s43_s20 }
  0x15   :  { %p2328_p9 = scmp.lt.u32.totalorder %s2324_s23, %s2974_s6 }
  0x17   :  { %p2330_p10 = pnand %p2328_p9, %p2325_p8 }
  0x19   :  { %2333 = shalt.err (!%p2330_p10)
}
  0x1a   :  { %s2334_s29 = scalar_lea.vmem %s44_s20, 256  ;;  %p2339_p12 = scmp.lt.s32.totalorder %s44_s20, %s44_s20 }
  0x1b   :  { %p2335_p11 = scmp.ne.s32.totalorder %s44_s20, %s2334_s29  ;;  %p2340_p13 = scmp.lt.s32.totalorder %s2334_s29, %s2334_s29 }
  0x1d   :  { %p2341_p0 = por %p2340_p13, %p2339_p12 }
  0x1f   :  { %p2342_p1 = pnand %p2341_p0, %p2335_p11 }
  0x21   :  { %2345 = shalt.err (!%p2342_p1)
}
  0x22   :  { %s2378_s3 = smov 64   ;;  %s2379_s28 = smov 4  }
  0x23   :  { %49 = dma.hbm_to_vmem [thread:$0]  %s2974_s6, 256, %s44_s20, [#allocation6], %s2378_s3, %s2378_s3, %s2379_s28  }
  0x24   :  { %2368 = dma.done.wait [#allocation3], 1024  }
  0x25   :  { %2369 = vsyncadd [#allocation3], 4294966272 }
  0x26   :  { %2370 = dma.done.wait [#allocation6], 256  }
  0x27   :  { %2371 = vsyncadd [#allocation6], 4294967040  ;;  %v2380_v0 = vmov 0.0   ;;  %v2381_v1 = vmov 0   ;;  %vm2382_vm0 = vmmov 0   ;;  %v2469_v6 = vld [vmem:[%s2972_s4] sm:$0xff]   ;;  %v67_v11 = vlaneseq }
  0x28   :  { %2002 = vmatprep.subr.bf16.mxu1 %v2380_v0  ;;  %171 = vmatprep.mubr.bf16.mxu0 %v2381_v1  ;;  %v2152_v2 = vld [vmem:[#allocation2 + $0x4] ss:$8 sps:$4 sm:$0xff]   ;;  %v2154_v3 = vld [vmem:[#allocation2] ss:$8 sps:$4 sm:$0xff]   ;;  %v2155_v4 = vld [vmem:[#allocation2 + $0x14] ss:$8 sps:$4 sm:$0xff]  }
  0x29   :  { %2006 = vmatprep.mubr.msk.bf16.mxu1 %vm2382_vm0, %v2380_v0  ;;  %2150 = vset.pattern.permute.xlu1 %v2381_v1  ;;  %v2157_v5 = vld [vmem:[#allocation2 + $0x10] ss:$8 sps:$4 sm:$0xff]   ;;  %vm135_vm1 = vcmask 261120   ;;  %v2501_v12 = vshrl.u32 %v67_v11, 7  ;;  %s2383_s25 = smov 32   ;;  %s2384_s26 = smov 96  }
  0x2a   :  { %2151 = vset.pattern.permute.xlu0 %v2381_v1  ;;  %139 = vmatprep.subr.bf16.mxu0 %v2152_v2  ;;  %v92_v7 = vld [vmem:[%s2970_s2] sm:$0xff]  ;;  %v93_v8 = vld [vmem:[%s2970_s2 + $0x8] sm:$0xff]  ;;  %v2532_v53 = vand.u32 127, %v67_v11  ;;  %vm902_vm5 = vcmask 1041408   ;;  %vm904_vm6 = vcmask 1043456   ;;  %vm906_vm7 = vcmask 1045504  }
  0x2b   :  { %140 = vmatpush1.bf16.msra.mxu0 %v2154_v3  ;;  %2003 = vmatpush3.bf16.msra.mxu1 %v2469_v6  ;;  %v2481_v9 = vld [vmem:[%s2972_s4 + $0x8] sm:$0xff]   ;;  %v103_v10 = vpack.c.bf16 %v93_v8, %v92_v7  ;;  %v111_v13 = vsub.s32 1, %v2501_v12  ;;  %v102_v14 = vld [vmem:[%s2973_s5] sm:$0x3]  ;;  %v107_v15 = vsub.s32 0, %v2501_v12 }
  0x2c   :  { %141 = vmatprep.subr.bf16.mxu0 %v2155_v4  ;;  %2004 = vmatprep.subr.bf16.mxu1 %v2380_v0  ;;  %v60_v39 = vld [vmem:[%s2968_s0 + $0x8] sm:$0xff]  ;;  %v59_v40 = vld [vmem:[%s2968_s0] sm:$0xff]  ;;  %vm69_vm4 = vcmp.lt.s32.totalorder %v2532_v53, 16 }
  0x2d   :  { %v112_v16 = vrot.slane %v102_v14, %v111_v13  ;;  %v108_v18 = vrot.slane %v102_v14, %v107_v15  ;;  %vm62_vm2 = vcmp.ne.s32.totalorder %v60_v39, 0  ;;  %vm61_vm3 = vcmp.ne.s32.totalorder %v59_v40, 0  ;;  %v2300_v53 = vld [vmem:[%s2970_s2] sm:$0xff] }
  0x2e   :  { %v1897_v41 = vsel %vm62_vm2, 1.0, %v2380_v0  ;;  %v1896_v42 = vsel %vm61_vm3, 1.0, %v2380_v0 }
  0x2f   :  { %142 = vmatpush1.bf16.msra.mxu0 %v2157_v5  ;;  %2005 = vmatpush3.bf16.msra.mxu1 %v2481_v9 }
  0x30   :  { %2010 = vmatprep.subr.bf16.mxu0 %v2380_v0  ;;  %2018 = vmatprep.subr.bf16.mxu1 %v2380_v0 }
  0x31   :  { %77 = vperm.xlu1 %2150, %v1897_v41  }
  0x32   :  { %1902 = vmatmul.mubr.msk.bf16.vlgmr.msra.gmra.mrb[0].mxu0 %vm135_vm1, %v103_v10  ;;  %2007 = vmatmul.mubr.bf16.vlgmr.msra.gmra.mrb[0].mxu1 %v2381_v1 }
  0x33   :  { %2011 = vmatpush3.bf16.msra.mxu0 %v2469_v6  ;;  %2014 = vmatprep.mubr.msk.bf16.mxu0 %vm2382_vm0, %v2380_v0 }
  0x34   :  { %2012 = vmatprep.subr.bf16.mxu0 %v2380_v0  ;;  %2019 = vmatpush3.bf16.msra.mxu1 %v2469_v6 }
  0x35   :  { %2022 = vmatprep.mubr.msk.bf16.mxu1 %vm2382_vm0, %v2380_v0  ;;  %2020 = vmatprep.subr.bf16.mxu1 %v2380_v0 }
  0x36   :  { %72 = vperm.xlu1 %2150, %v1896_v42  }
  0x37   :  { %2013 = vmatpush3.bf16.msra.mxu0 %v2481_v9 }
  0x38   :  { %2026 = vmatprep.subr.bf16.mxu0 %v2380_v0  ;;  %2021 = vmatpush3.bf16.msra.mxu1 %v2481_v9 }
  0x39   :  { %2034 = vmatprep.subr.bf16.mxu1 %v2380_v0 }
  0xb0   :  { %v2534_v54 = vpop.permute.xlu1 %77 }
  0xb1   :  { %v80_v55 = vrot.slane %v2534_v54, 6 }
  0xb5   :  { %v2538_v56 = vpop.permute.xlu1 %72 }
  0xb6   :  { %v2543_v57 = vsel %vm69_vm4, %v2538_v56, %v80_v55 }
 0x105   :  { %v173_v17 = vpop.f32.mrb[0].mxu0  ;;  %v235_v22 = vpop.f32.mrb[0].mxu1 }
 0x106   :  { %v175_v19 = vpop.f32.mrb[1].mxu0  ;;  %v2008_v25 = vpop.f32.mrb[1].mxu1  ;;  %v174_v30 = vadd.f32 %v173_v17, %v108_v18 }
 0x107   :  { %v176_v20 = vadd.f32 %v175_v19, %v112_v16  ;;  %v177_v21 = vpop.f32.mrb[2].mxu0  ;;  %v238_v29 = vpop.f32.mrb[2].mxu1 }
 0x108   :  { %v178_v23 = vadd.f32 %v177_v21, %v108_v18  ;;  %v179_v24 = vpop.f32.mrb[3].mxu0  ;;  %v2009_v31 = vpop.f32.mrb[3].mxu1 }
 0x109   :  { %v545_v26 = vrot.slane %v176_v20, 6  ;;  %v634_v27 = vrot.slane %v176_v20, 2  ;;  %v180_v28 = vadd.f32 %v179_v24, %v112_v16 }
 0x10b   :  { %v2512_v32 = vadd.f32 %v634_v27, %v178_v23  ;;  %v183_v33 = vrot.slane %v180_v28, 6  ;;  %v276_v34 = vrot.slane %v180_v28, 2  ;;  %v2514_v35 = vadd.f32 %v545_v26, %v178_v23 }
 0x10c   :  { %v83_v27 = vrot.slane %v2534_v54, 2 }
 0x10d   :  { %v2516_v36 = vadd.f32 %v183_v33, %v174_v30  ;;  %v2518_v37 = vadd.f32 %v276_v34, %v174_v30 }
 0x10e   :  { %v2569_v28 = vsel %vm69_vm4, %v2538_v56, %v83_v27 }
 0x10f   :  { %v241_v38 = vadd.f32 %v235_v22, %v2516_v36 }
 0x111   :  { %2170 = vtanh.f32 %v241_v38  ;;  %v1905_v44 = vmul.f32 -1.442695, %v241_v38 }
 0x113   :  { %2172 = vpow2.f32 %v1905_v44 }
 0x11b   :  { %v2171_v43 = vpop.eup %2170 }
 0x11c   :  { %251 = vrot.lane.b32.xlu0 %v2171_v43, %s2383_s25 }
 0x11d   :  { %v2173_v45 = vpop.eup %2172 }
 0x11e   :  { %v245_v46 = vadd.f32 1.0, %v2173_v45 }
 0x120   :  { %2174 = vrcp.f32 %v245_v46 }
 0x12a   :  { %v2175_v47 = vpop.eup %2174 }
 0x12b   :  { %v249_v50 = vmul.f32 0.0, %v2175_v47 }
 0x18e   :  { %v252_v48 = vpop.permute.xlu0 %251 }
 0x18f   :  { %v254_v49 = vmul.f32 %v2175_v47, %v252_v48 }
 0x191   :  { %256 = vrot.lane.b32.xlu0 %v254_v49, %s2383_s25 }
 0x203   :  { %v257_v51 = vpop.permute.xlu0 %256 }
 0x204   :  { %v259_v52 = vadd.f32 %v257_v51, %v249_v50 }
 0x206   :  { %261 = vrot.lane.b32.xlu0 %v259_v52, %s2384_s26 }
 0x278   :  { %v262_v58 = vpop.permute.xlu0 %261 }
 0x279   :  { %v264_v59 = vmul.f32 %v262_v58, %v2543_v57 }
 0x27b   :  { %2176 = vtanh.f32 %v264_v59  ;;  %v335_v63 = vrot.slane %v264_v59, 6 }
 0x285   :  { %v2177_v60 = vpop.eup %2176 }
 0x286   :  { %267 = vrot.lane.b32.xlu1 %v2177_v60, %s2378_s3 }
 0x2f8   :  { %v268_v61 = vpop.permute.xlu1 %267 }
 0x2f9   :  { %v270_v62 = vmul.f32 %v2175_v47, %v268_v61 }
 0x2fb   :  { %272 = vrot.lane.b32.xlu0 %v270_v62, %s2378_s3 }
 0x2ff   :  { %336 = vrot.lane.b32.xlu0 %v335_v63, %s2383_s25 }
 0x36d   :  { %v273_v2 = vpop.permute.xlu0 %272 }
 0x36e   :  { %v2550_v3 = vmul.f32 %v273_v2, %v2543_v57 }
 0x370   :  { %v279_v4 = vpack.c.bf16 %v2550_v3, %v2550_v3 }
 0x371   :  { %v337_v23 = vpop.permute.xlu0 %336 }
 0x372   :  { %2015 = vmatmul.mubr.msk.bf16.vlgmr.msra.gmra.mrb[4].mxu0 %vm135_vm1, %v279_v4 }
 0x373   :  { %2027 = vmatpush3.bf16.msra.mxu0 %v2469_v6  ;;  %2030 = vmatprep.mubr.msk.bf16.mxu0 %vm2382_vm0, %v2380_v0 }
 0x374   :  { %2028 = vmatprep.subr.bf16.mxu0 %v2380_v0 }
 0x377   :  { %2029 = vmatpush3.bf16.msra.mxu0 %v2481_v9 }
 0x378   :  { %2042 = vmatprep.subr.bf16.mxu0 %v2380_v0 }
 0x445   :  { %v317_v5 = vpop.f32.mrb[4].mxu0 }
 0x446   :  { %v324_v7 = vrot.slane %v317_v5, 6  ;;  %v2016_v8 = vpop.f32.mrb[5].mxu0 }
 0x447   :  { %v320_v10 = vpop.f32.mrb[6].mxu0 }
 0x448   :  { %v326_v11 = vadd.f32 %v324_v7, %v2518_v37  ;;  %v2017_v14 = vpop.f32.mrb[7].mxu0 }
 0x44a   :  { %2178 = vtanh.f32 %v326_v11  ;;  %v1907_v17 = vmul.f32 -1.442695, %v326_v11 }
 0x44c   :  { %2180 = vpow2.f32 %v1907_v17 }
 0x454   :  { %v2179_v16 = vpop.eup %2178 }
 0x455   :  { %341 = vrot.lane.b32.xlu1 %v2179_v16, %s2383_s25 }
 0x456   :  { %v2181_v18 = vpop.eup %2180 }
 0x457   :  { %v330_v19 = vadd.f32 1.0, %v2181_v18 }
 0x459   :  { %2182 = vrcp.f32 %v330_v19 }
 0x463   :  { %v2183_v20 = vpop.eup %2182 }
 0x464   :  { %v339_v24 = vmul.f32 %v2183_v20, %v337_v23 }
 0x4c7   :  { %v342_v21 = vpop.permute.xlu1 %341 }
 0x4c8   :  { %v344_v22 = vmul.f32 %v2183_v20, %v342_v21 }
 0x4ca   :  { %346 = vrot.lane.b32.xlu1 %v344_v22, %s2383_s25 }
 0x53c   :  { %v347_v25 = vpop.permute.xlu1 %346 }
 0x53d   :  { %v349_v26 = vadd.f32 %v347_v25, %v339_v24 }
 0x53f   :  { %351 = vrot.lane.b32.xlu0 %v349_v26, %s2384_s26 }
 0x5b1   :  { %v352_v29 = vpop.permute.xlu0 %351 }
 0x5b2   :  { %v354_v30 = vmul.f32 %v352_v29, %v2569_v28 }
 0x5b4   :  { %2184 = vtanh.f32 %v354_v30  ;;  %v424_v38 = vrot.slane %v354_v30, 6 }
 0x5be   :  { %v2185_v31 = vpop.eup %2184 }
 0x5bf   :  { %357 = vrot.lane.b32.xlu1 %v2185_v31, %s2378_s3 }
 0x631   :  { %v358_v33 = vpop.permute.xlu1 %357 }
 0x632   :  { %v360_v34 = vmul.f32 %v2183_v20, %v358_v33 }
 0x634   :  { %362 = vrot.lane.b32.xlu0 %v360_v34, %s2378_s3 }
 0x638   :  { %425 = vrot.lane.b32.xlu0 %v424_v38, %s2383_s25 }
 0x6a6   :  { %v363_v39 = vpop.permute.xlu0 %362 }
 0x6a7   :  { %v2576_v40 = vmul.f32 %v363_v39, %v2569_v28 }
 0x6a9   :  { %v366_v41 = vpack.c.bf16 %v2576_v40, %v2576_v40  ;;  %v903_v14 = vsel %vm902_vm5, %v2550_v3, %v2576_v40 }
 0x6aa   :  { %v426_v60 = vpop.permute.xlu0 %425 }
 0x6ab   :  { %v368_v42 = vrot.slane %v366_v41, 1 }
 0x6ad   :  { %2023 = vmatmul.mubr.msk.bf16.vlgmr.msra.gmra.mrb[4].mxu1 %vm135_vm1, %v368_v42 }
 0x6ae   :  { %2035 = vmatpush3.bf16.msra.mxu1 %v2469_v6  ;;  %2038 = vmatprep.mubr.msk.bf16.mxu1 %vm2382_vm0, %v2380_v0 }
 0x6af   :  { %2036 = vmatprep.subr.bf16.mxu1 %v2380_v0 }
 0x6b2   :  { %2037 = vmatpush3.bf16.msra.mxu1 %v2481_v9 }
 0x6b3   :  { %2050 = vmatprep.subr.bf16.mxu1 %v2380_v0 }
 0x780   :  { %v406_v43 = vpop.f32.mrb[4].mxu1 }
 0x781   :  { %v413_v44 = vrot.slane %v406_v43, 4  ;;  %v2024_v45 = vpop.f32.mrb[5].mxu1 }
 0x782   :  { %v409_v46 = vpop.f32.mrb[6].mxu1 }
 0x783   :  { %v415_v47 = vadd.f32 %v413_v44, %v2516_v36  ;;  %v2025_v48 = vpop.f32.mrb[7].mxu1 }
 0x785   :  { %2186 = vtanh.f32 %v415_v47  ;;  %v1909_v50 = vmul.f32 -1.442695, %v415_v47 }
 0x787   :  { %2188 = vpow2.f32 %v1909_v50 }
 0x78f   :  { %v2187_v49 = vpop.eup %2186 }
 0x790   :  { %430 = vrot.lane.b32.xlu1 %v2187_v49, %s2383_s25 }
 0x791   :  { %v2189_v51 = vpop.eup %2188 }
 0x792   :  { %v419_v52 = vadd.f32 1.0, %v2189_v51 }
 0x794   :  { %2190 = vrcp.f32 %v419_v52 }
 0x79e   :  { %v2191_v55 = vpop.eup %2190 }
 0x79f   :  { %v428_v61 = vmul.f32 %v2191_v55, %v426_v60 }
 0x802   :  { %v431_v58 = vpop.permute.xlu1 %430 }
 0x803   :  { %v433_v59 = vmul.f32 %v2191_v55, %v431_v58 }
 0x805   :  { %435 = vrot.lane.b32.xlu1 %v433_v59, %s2383_s25 }
 0x877   :  { %v436_v62 = vpop.permute.xlu1 %435 }
 0x878   :  { %v438_v63 = vadd.f32 %v436_v62, %v428_v61 }
 0x87a   :  { %440 = vrot.lane.b32.xlu0 %v438_v63, %s2384_s26 }
 0x8ec   :  { %v441_v36 = vpop.permute.xlu0 %440 }
 0x8ed   :  { %v443_v2 = vmul.f32 %v441_v36, %v2543_v57 }
 0x8ef   :  { %2192 = vtanh.f32 %v443_v2  ;;  %v513_v8 = vrot.slane %v443_v2, 6 }
 0x8f9   :  { %v2193_v4 = vpop.eup %2192 }
 0x8fa   :  { %446 = vrot.lane.b32.xlu1 %v2193_v4, %s2378_s3 }
 0x96c   :  { %v447_v5 = vpop.permute.xlu1 %446 }
 0x96d   :  { %v449_v7 = vmul.f32 %v2191_v55, %v447_v5  ;;  %v930_v55 = vrot.slane %v2576_v40, 6 }
 0x96f   :  { %451 = vrot.lane.b32.xlu0 %v449_v7, %s2378_s3 }
 0x973   :  { %514 = vrot.lane.b32.xlu0 %v513_v8, %s2383_s25 }
 0x9e1   :  { %v452_v10 = vpop.permute.xlu0 %451 }
 0x9e2   :  { %v454_v11 = vmul.f32 %v452_v10, %v2543_v57 }
 0x9e4   :  { %v455_v16 = vpack.c.bf16 %v454_v11, %v454_v11  ;;  %v905_v17 = vsel %vm904_vm6, %v903_v14, %v454_v11  ;;  %v927_v49 = vrot.slane %v454_v11, 2 }
 0x9e5   :  { %v515_v34 = vpop.permute.xlu0 %514 }
 0x9e6   :  { %v457_v18 = vrot.slane %v455_v16, 2 }
 0x9e8   :  { %2031 = vmatmul.mubr.msk.bf16.vlgmr.msra.gmra.mrb[8].mxu0 %vm135_vm1, %v457_v18 }
 0x9e9   :  { %2043 = vmatpush3.bf16.msra.mxu0 %v2469_v6  ;;  %2046 = vmatprep.mubr.msk.bf16.mxu0 %vm2382_vm0, %v2380_v0 }
 0x9ea   :  { %2044 = vmatprep.subr.bf16.mxu0 %v2380_v0 }
 0x9ed   :  { %2045 = vmatpush3.bf16.msra.mxu0 %v2481_v9 }
 0x9ee   :  { %2058 = vmatprep.subr.bf16.mxu0 %v2380_v0 }
 0xabb   :  { %v495_v19 = vpop.f32.mrb[8].mxu0 }
 0xabc   :  { %v502_v20 = vrot.slane %v495_v19, 2  ;;  %v2032_v21 = vpop.f32.mrb[9].mxu0  ;;  %v86_v19 = vrot.slane %v2538_v56, 6 }
 0xabd   :  { %v498_v22 = vpop.f32.mrb[10].mxu0 }
 0xabe   :  { %v504_v23 = vadd.f32 %v502_v20, %v2518_v37  ;;  %v2033_v24 = vpop.f32.mrb[11].mxu0  ;;  %v2638_v20 = vsel %vm69_vm4, %v2534_v54, %v86_v19 }
 0xac0   :  { %2194 = vtanh.f32 %v504_v23  ;;  %v1911_v26 = vmul.f32 -1.442695, %v504_v23 }
 0xac2   :  { %2196 = vpow2.f32 %v1911_v26 }
 0xaca   :  { %v2195_v25 = vpop.eup %2194 }
 0xacb   :  { %519 = vrot.lane.b32.xlu1 %v2195_v25, %s2383_s25 }
 0xacc   :  { %v2197_v27 = vpop.eup %2196 }
 0xacd   :  { %v508_v29 = vadd.f32 1.0, %v2197_v27 }
 0xacf   :  { %2198 = vrcp.f32 %v508_v29 }
 0xad9   :  { %v2199_v30 = vpop.eup %2198 }
 0xada   :  { %v517_v38 = vmul.f32 %v2199_v30, %v515_v34 }
 0xb3d   :  { %v520_v31 = vpop.permute.xlu1 %519 }
 0xb3e   :  { %v522_v33 = vmul.f32 %v2199_v30, %v520_v31 }
 0xb40   :  { %524 = vrot.lane.b32.xlu1 %v522_v33, %s2383_s25 }
 0xbb2   :  { %v525_v39 = vpop.permute.xlu1 %524 }
 0xbb3   :  { %v527_v41 = vadd.f32 %v525_v39, %v517_v38 }
 0xbb5   :  { %529 = vrot.lane.b32.xlu0 %v527_v41, %s2384_s26 }
 0xc27   :  { %v530_v37 = vpop.permute.xlu0 %529 }
 0xc28   :  { %v532_v42 = vmul.f32 %v530_v37, %v2569_v28 }
 0xc2a   :  { %2200 = vtanh.f32 %v532_v42  ;;  %v603_v46 = vrot.slane %v532_v42, 6 }
 0xc34   :  { %v2201_v43 = vpop.eup %2200 }
 0xc35   :  { %535 = vrot.lane.b32.xlu1 %v2201_v43, %s2378_s3 }
 0xca7   :  { %v536_v44 = vpop.permute.xlu1 %535 }
 0xca8   :  { %v538_v45 = vmul.f32 %v2199_v30, %v536_v44 }
 0xcaa   :  { %540 = vrot.lane.b32.xlu0 %v538_v45, %s2378_s3 }
 0xcae   :  { %604 = vrot.lane.b32.xlu0 %v603_v46, %s2383_s25 }
 0xd1c   :  { %v541_v47 = vpop.permute.xlu0 %540 }
 0xd1d   :  { %v543_v48 = vmul.f32 %v541_v47, %v2569_v28 }
 0xd1f   :  { %v548_v50 = vpack.c.bf16 %v543_v48, %v543_v48  ;;  %v2617_v51 = vsel %vm906_vm7, %v905_v17, %v543_v48  ;;  %v924_v52 = vrot.slane %v543_v48, 6 }
 0xd20   :  { %v605_v14 = vpop.permute.xlu0 %604 }
 0xd21   :  { %v550_v58 = vrot.slane %v548_v50, 3  ;;  %v938_v59 = vsel %vm902_vm5, %v924_v52, %v927_v49  ;;  %v89_v50 = vrot.slane %v2538_v56, 2 }
 0xd22   :  { %v2622_v60 = vsel %vm904_vm6, %v938_v59, %v930_v55 }
 0xd23   :  { %2039 = vmatmul.mubr.msk.bf16.vlgmr.msra.gmra.mrb[8].mxu1 %vm135_vm1, %v550_v58  ;;  %v2664_v52 = vsel %vm69_vm4, %v2534_v54, %v89_v50 }
 0xd24   :  { %2051 = vmatpush3.bf16.msra.mxu1 %v2469_v6  ;;  %2054 = vmatprep.mubr.msk.bf16.mxu1 %vm2382_vm0, %v2380_v0 }
 0xd25   :  { %2052 = vmatprep.subr.bf16.mxu1 %v2380_v0 }
 0xd28   :  { %2053 = vmatpush3.bf16.msra.mxu1 %v2481_v9 }
 0xdf6   :  { %v588_v61 = vpop.f32.mrb[8].mxu1 }
 0xdf7   :  { %v594_v40 = vadd.f32 %v588_v61, %v2514_v35  ;;  %v2040_v62 = vpop.f32.mrb[9].mxu1 }
 0xdf8   :  { %v591_v63 = vpop.f32.mrb[10].mxu1 }
 0xdf9   :  { %2202 = vtanh.f32 %v594_v40  ;;  %v2041_v36 = vpop.f32.mrb[11].mxu1  ;;  %v1913_v4 = vmul.f32 -1.442695, %v594_v40 }
 0xdfb   :  { %2204 = vpow2.f32 %v1913_v4 }
 0xe03   :  { %v2203_v2 = vpop.eup %2202 }
 0xe04   :  { %609 = vrot.lane.b32.xlu1 %v2203_v2, %s2383_s25 }
 0xe05   :  { %v2205_v5 = vpop.eup %2204 }
 0xe06   :  { %v598_v7 = vadd.f32 1.0, %v2205_v5 }
 0xe08   :  { %2206 = vrcp.f32 %v598_v7 }
 0xe12   :  { %v2207_v8 = vpop.eup %2206 }
 0xe13   :  { %v607_v16 = vmul.f32 %v2207_v8, %v605_v14 }
 0xe76   :  { %v610_v10 = vpop.permute.xlu1 %609 }
 0xe77   :  { %v612_v11 = vmul.f32 %v2207_v8, %v610_v10 }
 0xe79   :  { %614 = vrot.lane.b32.xlu1 %v612_v11, %s2383_s25 }
 0xeeb   :  { %v615_v17 = vpop.permute.xlu1 %614 }
 0xeec   :  { %v617_v18 = vadd.f32 %v615_v17, %v607_v16 }
 0xeee   :  { %619 = vrot.lane.b32.xlu0 %v617_v18, %s2384_s26 }
 0xf60   :  { %v620_v21 = vpop.permute.xlu0 %619 }
 0xf61   :  { %v622_v22 = vmul.f32 %v620_v21, %v2638_v20 }
 0xf63   :  { %2208 = vtanh.f32 %v622_v22  ;;  %v693_v26 = vrot.slane %v622_v22, 6 }
 0xf6d   :  { %v2209_v23 = vpop.eup %2208 }
 0xf6e   :  { %625 = vrot.lane.b32.xlu1 %v2209_v23, %s2378_s3 }
 0xfe0   :  { %v626_v24 = vpop.permute.xlu1 %625 }
 0xfe1   :  { %v628_v25 = vmul.f32 %v2207_v8, %v626_v24 }
 0xfe3   :  { %630 = vrot.lane.b32.xlu0 %v628_v25, %s2378_s3 }
 0xfe7   :  { %694 = vrot.lane.b32.xlu0 %v693_v26, %s2383_s25 }
0x1055   :  { %v631_v27 = vpop.permute.xlu0 %630 }
0x1056   :  { %v2645_v29 = vmul.f32 %v631_v27, %v2638_v20 }
0x1058   :  { %v637_v30 = vpack.c.bf16 %v2645_v29, %v2645_v29 }
0x1059   :  { %v695_v46 = vpop.permute.xlu0 %694 }
0x105a   :  { %2047 = vmatmul.mubr.msk.bf16.vlgmr.msra.gmra.mrb[12].mxu0 %vm135_vm1, %v637_v30 }
0x105b   :  { %2059 = vmatpush3.bf16.msra.mxu0 %v2469_v6  ;;  %2062 = vmatprep.mubr.msk.bf16.mxu0 %vm2382_vm0, %v2380_v0 }
0x105c   :  { %2060 = vmatprep.subr.bf16.mxu0 %v2380_v0 }
0x105f   :  { %2061 = vmatpush3.bf16.msra.mxu0 %v2481_v9 }
0x1060   :  { %2066 = vmatprep.subr.bf16.mxu0 %v2380_v0 }
0x112d   :  { %v675_v31 = vpop.f32.mrb[12].mxu0 }
0x112e   :  { %v682_v33 = vrot.slane %v675_v31, 6  ;;  %v2048_v34 = vpop.f32.mrb[13].mxu0 }
0x112f   :  { %v678_v38 = vpop.f32.mrb[14].mxu0 }
0x1130   :  { %v684_v39 = vadd.f32 %v682_v33, %v2512_v32  ;;  %v2049_v41 = vpop.f32.mrb[15].mxu0 }
0x1132   :  { %2210 = vtanh.f32 %v684_v39  ;;  %v1915_v6 = vmul.f32 -1.442695, %v684_v39 }
0x1134   :  { %2212 = vpow2.f32 %v1915_v6 }
0x113c   :  { %v2211_v37 = vpop.eup %2210 }
0x113d   :  { %699 = vrot.lane.b32.xlu1 %v2211_v37, %s2383_s25 }
0x113e   :  { %v2213_v42 = vpop.eup %2212 }
0x113f   :  { %v688_v43 = vadd.f32 1.0, %v2213_v42 }
0x1141   :  { %2214 = vrcp.f32 %v688_v43 }
0x114b   :  { %v2215_v44 = vpop.eup %2214 }
0x114c   :  { %v697_v47 = vmul.f32 %v2215_v44, %v695_v46 }
0x11af   :  { %v700_v9 = vpop.permute.xlu1 %699 }
0x11b0   :  { %v702_v45 = vmul.f32 %v2215_v44, %v700_v9 }
0x11b2   :  { %704 = vrot.lane.b32.xlu1 %v702_v45, %s2383_s25 }
0x1224   :  { %v705_v48 = vpop.permute.xlu1 %704 }
0x1225   :  { %v707_v49 = vadd.f32 %v705_v48, %v697_v47 }
0x1227   :  { %709 = vrot.lane.b32.xlu0 %v707_v49, %s2384_s26 }
0x1299   :  { %v710_v55 = vpop.permute.xlu0 %709 }
0x129a   :  { %v712_v58 = vmul.f32 %v710_v55, %v2664_v52 }
0x129c   :  { %2216 = vtanh.f32 %v712_v58  ;;  %v782_v62 = vrot.slane %v712_v58, 6 }
0x12a6   :  { %v2217_v59 = vpop.eup %2216 }
0x12a7   :  { %715 = vrot.lane.b32.xlu1 %v2217_v59, %s2378_s3 }
0x1319   :  { %v716_v61 = vpop.permute.xlu1 %715 }
0x131a   :  { %v718_v40 = vmul.f32 %v2215_v44, %v716_v61 }
0x131c   :  { %720 = vrot.lane.b32.xlu0 %v718_v40, %s2378_s3 }
0x1320   :  { %783 = vrot.lane.b32.xlu0 %v782_v62, %s2383_s25 }
0x138e   :  { %v721_v56 = vpop.permute.xlu0 %720 }
0x138f   :  { %v2671_v63 = vmul.f32 %v721_v56, %v2664_v52 }
0x1391   :  { %v724_v54 = vpack.c.bf16 %v2671_v63, %v2671_v63  ;;  %v908_v39 = vsel %vm902_vm5, %v2645_v29, %v2671_v63 }
0x1392   :  { %v784_v22 = vpop.permute.xlu0 %783 }
0x1393   :  { %v726_v36 = vrot.slane %v724_v54, 1 }
0x1395   :  { %2055 = vmatmul.mubr.msk.bf16.vlgmr.msra.gmra.mrb[12].mxu1 %vm135_vm1, %v726_v36 }
0x1396   :  { %1022 = vmatprep.mubr.bf16.mxu1 %v2381_v1 }
0x1468   :  { %v764_v2 = vpop.f32.mrb[12].mxu1 }
0x1469   :  { %v771_v4 = vrot.slane %v764_v2, 4  ;;  %v2056_v5 = vpop.f32.mrb[13].mxu1  ;;  %v2162_v2 = vld [vmem:[#allocation2 + $0x24] ss:$8 sps:$4 sm:$0xff]  }
0x146a   :  { %v767_v7 = vpop.f32.mrb[14].mxu1  ;;  %990 = vmatprep.subr.bf16.mxu1 %v2162_v2  ;;  %v2165_v5 = vld [vmem:[#allocation2 + $0x34] ss:$8 sps:$4 sm:$0xff]  }
0x146b   :  { %v773_v8 = vadd.f32 %v771_v4, %v2514_v35  ;;  %v2057_v10 = vpop.f32.mrb[15].mxu1  ;;  %v2160_v4 = vld [vmem:[#allocation2 + $0x20] ss:$8 sps:$4 sm:$0xff]   ;;  %v2163_v7 = vld [vmem:[#allocation2 + $0x30] ss:$8 sps:$4 sm:$0xff]  }
0x146c   :  { %991 = vmatpush1.bf16.msra.mxu1 %v2160_v4 }
0x146d   :  { %2218 = vtanh.f32 %v773_v8  ;;  %v1917_v14 = vmul.f32 -1.442695, %v773_v8  ;;  %992 = vmatprep.subr.bf16.mxu1 %v2165_v5  ;;  %v2707_v8 = vld [vmem:[%s2972_s4 + $0x10] sm:$0xff]  }
0x146f   :  { %2220 = vpow2.f32 %v1917_v14 }
0x1470   :  { %993 = vmatpush1.bf16.msra.mxu1 %v2163_v7 }
0x1471   :  { %2074 = vmatprep.subr.bf16.mxu1 %v2380_v0 }
0x1477   :  { %v2219_v11 = vpop.eup %2218 }
0x1478   :  { %788 = vrot.lane.b32.xlu1 %v2219_v11, %s2383_s25  ;;  %v2715_v11 = vld [vmem:[%s2972_s4 + $0x18] sm:$0xff]  }
0x1479   :  { %v2221_v16 = vpop.eup %2220 }
0x147a   :  { %v777_v17 = vadd.f32 1.0, %v2221_v16 }
0x147c   :  { %2222 = vrcp.f32 %v777_v17  ;;  %v933_v17 = vrot.slane %v2550_v3, 2 }
0x1486   :  { %v2223_v18 = vpop.eup %2222 }
0x1487   :  { %v786_v23 = vmul.f32 %v2223_v18, %v784_v22 }
0x14ea   :  { %v789_v19 = vpop.permute.xlu1 %788 }
0x14eb   :  { %v791_v21 = vmul.f32 %v2223_v18, %v789_v19 }
0x14ed   :  { %793 = vrot.lane.b32.xlu1 %v791_v21, %s2383_s25  ;;  %v940_v21 = vsel %vm906_vm7, %v2622_v60, %v933_v17 }
0x155f   :  { %v794_v24 = vpop.permute.xlu1 %793 }
0x1560   :  { %v796_v25 = vadd.f32 %v794_v24, %v786_v23  ;;  %v918_v24 = vrot.slane %v2671_v63, 6 }
0x1562   :  { %798 = vrot.lane.b32.xlu0 %v796_v25, %s2384_s26 }
0x15d4   :  { %v799_v35 = vpop.permute.xlu0 %798 }
0x15d5   :  { %v801_v26 = vmul.f32 %v799_v35, %v2638_v20  ;;  %v921_v35 = vrot.slane %v2645_v29, 2 }
0x15d7   :  { %2224 = vtanh.f32 %v801_v26  ;;  %v871_v33 = vrot.slane %v801_v26, 6 }
0x15e1   :  { %v2225_v27 = vpop.eup %2224 }
0x15e2   :  { %804 = vrot.lane.b32.xlu1 %v2225_v27, %s2378_s3 }
0x1654   :  { %v805_v30 = vpop.permute.xlu1 %804 }
0x1655   :  { %v807_v31 = vmul.f32 %v2223_v18, %v805_v30 }
0x1657   :  { %809 = vrot.lane.b32.xlu0 %v807_v31, %s2378_s3 }
0x165b   :  { %872 = vrot.lane.b32.xlu0 %v871_v33, %s2383_s25 }
0x16c9   :  { %v810_v34 = vpop.permute.xlu0 %809 }
0x16ca   :  { %v2686_v38 = vmul.f32 %v810_v34, %v2638_v20 }
0x16cc   :  { %v813_v41 = vpack.c.bf16 %v2686_v38, %v2686_v38  ;;  %v909_v37 = vsel %vm904_vm6, %v908_v39, %v2686_v38  ;;  %v915_v19 = vrot.slane %v2686_v38, 2 }
0x16cd   :  { %v873_v61 = vpop.permute.xlu0 %872 }
0x16ce   :  { %v815_v6 = vrot.slane %v813_v41, 2 }
0x16d0   :  { %2063 = vmatmul.mubr.msk.bf16.vlgmr.msra.gmra.mrb[16].mxu0 %vm135_vm1, %v815_v6 }
0x16d1   :  { %2070 = vmatprep.mubr.msk.bf16.mxu0 %vm2382_vm0, %v2380_v0  ;;  %2067 = vmatpush3.bf16.msra.mxu0 %v2707_v8 }
0x16d2   :  { %2068 = vmatprep.subr.bf16.mxu0 %v2380_v0 }
0x16d5   :  { %2069 = vmatpush3.bf16.msra.mxu0 %v2715_v11 }
0x16d6   :  { %2082 = vmatprep.subr.bf16.mxu0 %v2380_v0 }
0x16d8   :  { %2071 = vmatmul.mubr.bf16.vlgmr.msra.gmra.mrb[20].mxu0 %v2381_v1 }
0x16d9   :  { %2083 = vmatpush3.bf16.msra.mxu0 %v2707_v8  ;;  %2086 = vmatprep.mubr.msk.bf16.mxu0 %vm2382_vm0, %v2380_v0 }
0x16da   :  { %2084 = vmatprep.subr.bf16.mxu0 %v2380_v0 }
0x16dd   :  { %2085 = vmatpush3.bf16.msra.mxu0 %v2715_v11 }
0x16de   :  { %2098 = vmatprep.subr.bf16.mxu0 %v2380_v0 }
0x17a3   :  { %v853_v42 = vpop.f32.mrb[16].mxu0 }
0x17a4   :  { %v860_v43 = vrot.slane %v853_v42, 2  ;;  %v2064_v44 = vpop.f32.mrb[17].mxu0 }
0x17a5   :  { %v856_v9 = vpop.f32.mrb[18].mxu0 }
0x17a6   :  { %v862_v45 = vadd.f32 %v860_v43, %v2512_v32  ;;  %v2065_v46 = vpop.f32.mrb[19].mxu0 }
0x17a8   :  { %2226 = vtanh.f32 %v862_v45  ;;  %v1919_v48 = vmul.f32 -1.442695, %v862_v45 }
0x17aa   :  { %2228 = vpow2.f32 %v1919_v48 }
0x17ab   :  { %v1083_v29 = vpop.f32.mrb[20].mxu0 }
0x17ac   :  { %v2072_v63 = vpop.f32.mrb[21].mxu0 }
0x17ad   :  { %v1086_v31 = vpop.f32.mrb[22].mxu0 }
0x17ae   :  { %v2073_v33 = vpop.f32.mrb[23].mxu0 }
0x17b2   :  { %v2227_v47 = vpop.eup %2226 }
0x17b3   :  { %877 = vrot.lane.b32.xlu1 %v2227_v47, %s2383_s25 }
0x17b4   :  { %v2229_v49 = vpop.eup %2228 }
0x17b5   :  { %v866_v50 = vadd.f32 1.0, %v2229_v49 }
0x17b7   :  { %2230 = vrcp.f32 %v866_v50 }
0x17c1   :  { %v2231_v55 = vpop.eup %2230 }
0x17c2   :  { %v875_v40 = vmul.f32 %v2231_v55, %v873_v61 }
0x1825   :  { %v878_v58 = vpop.permute.xlu1 %877 }
0x1826   :  { %v880_v59 = vmul.f32 %v2231_v55, %v878_v58 }
0x1828   :  { %882 = vrot.lane.b32.xlu1 %v880_v59, %s2383_s25 }
0x189a   :  { %v883_v62 = vpop.permute.xlu1 %882 }
0x189b   :  { %v885_v56 = vadd.f32 %v883_v62, %v875_v40 }
0x189d   :  { %887 = vrot.lane.b32.xlu0 %v885_v56, %s2384_s26 }
0x190f   :  { %v888_v32 = vpop.permute.xlu0 %887 }
0x1910   :  { %v890_v54 = vmul.f32 %v888_v32, %v2664_v52 }
0x1912   :  { %2232 = vtanh.f32 %v890_v54 }
0x191c   :  { %v2233_v36 = vpop.eup %2232 }
0x191d   :  { %893 = vrot.lane.b32.xlu1 %v2233_v36, %s2378_s3 }
0x198f   :  { %v894_v10 = vpop.permute.xlu1 %893 }
0x1990   :  { %v896_v14 = vmul.f32 %v2231_v55, %v894_v10 }
0x1992   :  { %898 = vrot.lane.b32.xlu0 %v896_v14, %s2378_s3 }
0x1a04   :  { %v899_v16 = vpop.permute.xlu0 %898 }
0x1a05   :  { %v901_v18 = vmul.f32 %v899_v16, %v2664_v52 }
0x1a07   :  { %v910_v22 = vsel %vm906_vm7, %v909_v37, %v901_v18  ;;  %v912_v23 = vrot.slane %v901_v18, 6 }
0x1a08   :  { %v942_v25 = vsel %vm69_vm4, %v910_v22, %v940_v21 }
0x1a09   :  { %v935_v26 = vsel %vm902_vm5, %v912_v23, %v915_v19 }
0x1a0a   :  { %v936_v3 = vsel %vm904_vm6, %v935_v26, %v918_v24 }
0x1a0b   :  { %v937_v27 = vsel %vm906_vm7, %v936_v3, %v921_v35 }
0x1a0c   :  { %v941_v60 = vsel %vm69_vm4, %v2617_v51, %v937_v27  ;;  %v1924_v51 = vld [vmem:[%s2973_s5 + $0x2] sm:$0x3] }
0x1a0d   :  { %v955_v30 = vpack.c.bf16 %v942_v25, %v941_v60  ;;  %v964_v34 = vrot.slane %v1924_v51, %v111_v13  ;;  %v960_v39 = vrot.slane %v1924_v51, %v107_v15 }
0x1a0f   :  { %1929 = vmatmul.mubr.msk.bf16.vlgmr.msra.gmra.mrb[16].mxu1 %vm135_vm1, %v955_v30 }
0x1a10   :  { %2075 = vmatpush3.bf16.msra.mxu1 %v2707_v8  ;;  %2078 = vmatprep.mubr.msk.bf16.mxu1 %vm2382_vm0, %v2380_v0 }
0x1a11   :  { %2076 = vmatprep.subr.bf16.mxu1 %v2380_v0 }
0x1a14   :  { %2077 = vmatpush3.bf16.msra.mxu1 %v2715_v11 }
0x1a15   :  { %2090 = vmatprep.subr.bf16.mxu1 %v2380_v0 }
0x1ae2   :  { %v1024_v38 = vpop.f32.mrb[16].mxu1 }
0x1ae3   :  { %v1026_v41 = vpop.f32.mrb[17].mxu1  ;;  %v1025_v46 = vadd.f32 %v1024_v38, %v960_v39 }
0x1ae4   :  { %v1027_v37 = vadd.f32 %v1026_v41, %v964_v34  ;;  %v1028_v6 = vpop.f32.mrb[18].mxu1 }
0x1ae5   :  { %v1029_v42 = vadd.f32 %v1028_v6, %v960_v39  ;;  %v1030_v43 = vpop.f32.mrb[19].mxu1 }
0x1ae6   :  { %v1393_v44 = vrot.slane %v1027_v37, 6  ;;  %v1482_v9 = vrot.slane %v1027_v37, 2  ;;  %v1031_v45 = vadd.f32 %v1030_v43, %v964_v34 }
0x1ae8   :  { %v2757_v47 = vadd.f32 %v1482_v9, %v1029_v42  ;;  %v1034_v48 = vrot.slane %v1031_v45, 6  ;;  %v1124_v49 = vrot.slane %v1031_v45, 2  ;;  %v2759_v50 = vadd.f32 %v1393_v44, %v1029_v42 }
0x1aea   :  { %v2761_v13 = vadd.f32 %v1034_v48, %v1025_v46  ;;  %v2763_v55 = vadd.f32 %v1124_v49, %v1025_v46 }
0x1aec   :  { %v1089_v12 = vadd.f32 %v1083_v29, %v2761_v13 }
0x1aee   :  { %2234 = vtanh.f32 %v1089_v12  ;;  %v1932_v58 = vmul.f32 -1.442695, %v1089_v12 }
0x1af0   :  { %2236 = vpow2.f32 %v1932_v58 }
0x1af8   :  { %v2235_v15 = vpop.eup %2234 }
0x1af9   :  { %1099 = vrot.lane.b32.xlu1 %v2235_v15, %s2383_s25 }
0x1afa   :  { %v2237_v59 = vpop.eup %2236 }
0x1afb   :  { %v1093_v61 = vadd.f32 1.0, %v2237_v59 }
0x1afd   :  { %2238 = vrcp.f32 %v1093_v61 }
0x1b07   :  { %v2239_v40 = vpop.eup %2238 }
0x1b08   :  { %v1097_v32 = vmul.f32 0.0, %v2239_v40 }
0x1b6b   :  { %v1100_v62 = vpop.permute.xlu1 %1099 }
0x1b6c   :  { %v1102_v56 = vmul.f32 %v2239_v40, %v1100_v62 }
0x1b6e   :  { %1104 = vrot.lane.b32.xlu0 %v1102_v56, %s2383_s25 }
0x1be0   :  { %v1105_v54 = vpop.permute.xlu0 %1104 }
0x1be1   :  { %v1107_v36 = vadd.f32 %v1105_v54, %v1097_v32 }
0x1be3   :  { %1109 = vrot.lane.b32.xlu1 %v1107_v36, %s2384_s26 }
0x1c55   :  { %v1110_v2 = vpop.permute.xlu1 %1109 }
0x1c56   :  { %v1112_v4 = vmul.f32 %v1110_v2, %v2543_v57 }
0x1c58   :  { %2240 = vtanh.f32 %v1112_v4  ;;  %v1183_v14 = vrot.slane %v1112_v4, 6 }
0x1c62   :  { %v2241_v5 = vpop.eup %2240 }
0x1c63   :  { %1115 = vrot.lane.b32.xlu0 %v2241_v5, %s2378_s3 }
0x1cd5   :  { %v1116_v7 = vpop.permute.xlu0 %1115 }
0x1cd6   :  { %v1118_v10 = vmul.f32 %v2239_v40, %v1116_v7 }
0x1cd8   :  { %1120 = vrot.lane.b32.xlu1 %v1118_v10, %s2378_s3 }
0x1cdc   :  { %1184 = vrot.lane.b32.xlu1 %v1183_v14, %s2383_s25 }
0x1d4a   :  { %v1121_v16 = vpop.permute.xlu1 %1120 }
0x1d4b   :  { %v2774_v17 = vmul.f32 %v1121_v16, %v2543_v57 }
0x1d4d   :  { %v1127_v18 = vpack.c.bf16 %v2774_v17, %v2774_v17 }
0x1d4e   :  { %v1185_v63 = vpop.permute.xlu1 %1184 }
0x1d4f   :  { %2079 = vmatmul.mubr.msk.bf16.vlgmr.msra.gmra.mrb[20].mxu1 %vm135_vm1, %v1127_v18 }
0x1d50   :  { %2091 = vmatpush3.bf16.msra.mxu1 %v2707_v8  ;;  %2094 = vmatprep.mubr.msk.bf16.mxu1 %vm2382_vm0, %v2380_v0 }
0x1d51   :  { %2092 = vmatprep.subr.bf16.mxu1 %v2380_v0 }
0x1d54   :  { %2093 = vmatpush3.bf16.msra.mxu1 %v2715_v11 }
0x1d55   :  { %2106 = vmatprep.subr.bf16.mxu1 %v2380_v0 }
0x1e22   :  { %v1165_v19 = vpop.f32.mrb[20].mxu1 }
0x1e23   :  { %v1172_v21 = vrot.slane %v1165_v19, 6  ;;  %v2080_v22 = vpop.f32.mrb[21].mxu1 }
0x1e24   :  { %v1168_v23 = vpop.f32.mrb[22].mxu1 }
0x1e25   :  { %v1174_v24 = vadd.f32 %v1172_v21, %v2763_v55  ;;  %v2081_v25 = vpop.f32.mrb[23].mxu1 }
0x1e27   :  { %2242 = vtanh.f32 %v1174_v24  ;;  %v1934_v26 = vmul.f32 -1.442695, %v1174_v24 }
0x1e29   :  { %2244 = vpow2.f32 %v1934_v26 }
0x1e31   :  { %v2243_v35 = vpop.eup %2242 }
0x1e32   :  { %1189 = vrot.lane.b32.xlu0 %v2243_v35, %s2383_s25 }
0x1e33   :  { %v2245_v3 = vpop.eup %2244 }
0x1e34   :  { %v1178_v27 = vadd.f32 1.0, %v2245_v3 }
0x1e36   :  { %2246 = vrcp.f32 %v1178_v27 }
0x1e40   :  { %v2247_v60 = vpop.eup %2246 }
0x1e41   :  { %v1187_v31 = vmul.f32 %v2247_v60, %v1185_v63 }
0x1ea4   :  { %v1190_v30 = vpop.permute.xlu0 %1189 }
0x1ea5   :  { %v1192_v29 = vmul.f32 %v2247_v60, %v1190_v30 }
0x1ea7   :  { %1194 = vrot.lane.b32.xlu0 %v1192_v29, %s2383_s25 }
0x1f19   :  { %v1195_v33 = vpop.permute.xlu0 %1194 }
0x1f1a   :  { %v1197_v51 = vadd.f32 %v1195_v33, %v1187_v31 }
0x1f1c   :  { %1199 = vrot.lane.b32.xlu1 %v1197_v51, %s2384_s26 }
0x1f8e   :  { %v1200_v34 = vpop.permute.xlu1 %1199 }
0x1f8f   :  { %v1202_v38 = vmul.f32 %v1200_v34, %v2569_v28 }
0x1f91   :  { %2248 = vtanh.f32 %v1202_v38  ;;  %v1272_v6 = vrot.slane %v1202_v38, 6 }
0x1f9b   :  { %v2249_v39 = vpop.eup %2248 }
0x1f9c   :  { %1205 = vrot.lane.b32.xlu0 %v2249_v39, %s2378_s3 }
0x200e   :  { %v1206_v41 = vpop.permute.xlu0 %1205 }
0x200f   :  { %v1208_v37 = vmul.f32 %v2247_v60, %v1206_v41 }
0x2011   :  { %1210 = vrot.lane.b32.xlu1 %v1208_v37, %s2378_s3 }
0x2015   :  { %1273 = vrot.lane.b32.xlu1 %v1272_v6, %s2383_s25 }
0x2083   :  { %v1211_v42 = vpop.permute.xlu1 %1210 }
0x2084   :  { %v2794_v43 = vmul.f32 %v1211_v42, %v2569_v28 }
0x2086   :  { %v1214_v44 = vpack.c.bf16 %v2794_v43, %v2794_v43  ;;  %v1750_v21 = vsel %vm902_vm5, %v2774_v17, %v2794_v43 }
0x2087   :  { %v1274_v54 = vpop.permute.xlu1 %1273 }
0x2088   :  { %v1216_v9 = vrot.slane %v1214_v44, 1 }
0x208a   :  { %2087 = vmatmul.mubr.msk.bf16.vlgmr.msra.gmra.mrb[24].mxu0 %vm135_vm1, %v1216_v9 }
0x208b   :  { %2099 = vmatpush3.bf16.msra.mxu0 %v2707_v8  ;;  %2102 = vmatprep.mubr.msk.bf16.mxu0 %vm2382_vm0, %v2380_v0 }
0x208c   :  { %2100 = vmatprep.subr.bf16.mxu0 %v2380_v0 }
0x208f   :  { %2101 = vmatpush3.bf16.msra.mxu0 %v2715_v11 }
0x2090   :  { %2114 = vmatprep.subr.bf16.mxu0 %v2380_v0 }
0x215d   :  { %v1254_v45 = vpop.f32.mrb[24].mxu0 }
0x215e   :  { %v1261_v46 = vrot.slane %v1254_v45, 4  ;;  %v2088_v48 = vpop.f32.mrb[25].mxu0 }
0x215f   :  { %v1257_v49 = vpop.f32.mrb[26].mxu0 }
0x2160   :  { %v1263_v12 = vadd.f32 %v1261_v46, %v2761_v13  ;;  %v2089_v15 = vpop.f32.mrb[27].mxu0 }
0x2162   :  { %2250 = vtanh.f32 %v1263_v12  ;;  %v1936_v59 = vmul.f32 -1.442695, %v1263_v12 }
0x2164   :  { %2252 = vpow2.f32 %v1936_v59 }
0x216c   :  { %v2251_v58 = vpop.eup %2250 }
0x216d   :  { %1278 = vrot.lane.b32.xlu0 %v2251_v58, %s2383_s25  ;;  %v1775_v58 = vrot.slane %v2794_v43, 6 }
0x216e   :  { %v2253_v61 = vpop.eup %2252 }
0x216f   :  { %v1267_v40 = vadd.f32 1.0, %v2253_v61 }
0x2171   :  { %2254 = vrcp.f32 %v1267_v40 }
0x217b   :  { %v2255_v62 = vpop.eup %2254 }
0x217c   :  { %v1276_v36 = vmul.f32 %v2255_v62, %v1274_v54 }
0x21df   :  { %v1279_v56 = vpop.permute.xlu0 %1278 }
0x21e0   :  { %v1281_v32 = vmul.f32 %v2255_v62, %v1279_v56 }
0x21e2   :  { %1283 = vrot.lane.b32.xlu0 %v1281_v32, %s2383_s25 }
0x2254   :  { %v1284_v2 = vpop.permute.xlu0 %1283 }
0x2255   :  { %v1286_v4 = vadd.f32 %v1284_v2, %v1276_v36 }
0x2257   :  { %1288 = vrot.lane.b32.xlu1 %v1286_v4, %s2384_s26 }
0x22c9   :  { %v1289_v13 = vpop.permute.xlu1 %1288 }
0x22ca   :  { %v1291_v5 = vmul.f32 %v1289_v13, %v2543_v57 }
0x22cc   :  { %2256 = vtanh.f32 %v1291_v5  ;;  %v1361_v16 = vrot.slane %v1291_v5, 6 }
0x22d6   :  { %v2257_v7 = vpop.eup %2256 }
0x22d7   :  { %1294 = vrot.lane.b32.xlu0 %v2257_v7, %s2378_s3 }
0x2349   :  { %v1295_v10 = vpop.permute.xlu0 %1294 }
0x234a   :  { %v1297_v14 = vmul.f32 %v2255_v62, %v1295_v10 }
0x234c   :  { %1299 = vrot.lane.b32.xlu1 %v1297_v14, %s2378_s3 }
0x2350   :  { %1362 = vrot.lane.b32.xlu1 %v1361_v16, %s2383_s25 }
0x23be   :  { %v1300_v18 = vpop.permute.xlu1 %1299 }
0x23bf   :  { %v1302_v19 = vmul.f32 %v1300_v18, %v2543_v57 }
0x23c1   :  { %v1303_v22 = vpack.c.bf16 %v1302_v19, %v1302_v19  ;;  %v1751_v23 = vsel %vm904_vm6, %v1750_v21, %v1302_v19  ;;  %v1772_v48 = vrot.slane %v1302_v19, 2 }
0x23c2   :  { %v1363_v34 = vpop.permute.xlu1 %1362 }
0x23c3   :  { %v1305_v24 = vrot.slane %v1303_v22, 2 }
0x23c5   :  { %2095 = vmatmul.mubr.msk.bf16.vlgmr.msra.gmra.mrb[24].mxu1 %vm135_vm1, %v1305_v24 }
0x23c6   :  { %2107 = vmatpush3.bf16.msra.mxu1 %v2707_v8  ;;  %2110 = vmatprep.mubr.msk.bf16.mxu1 %vm2382_vm0, %v2380_v0 }
0x23c7   :  { %2108 = vmatprep.subr.bf16.mxu1 %v2380_v0 }
0x23ca   :  { %2109 = vmatpush3.bf16.msra.mxu1 %v2715_v11 }
0x23cb   :  { %2122 = vmatprep.subr.bf16.mxu1 %v2380_v0 }
0x2498   :  { %v1343_v57 = vpop.f32.mrb[24].mxu1 }
0x2499   :  { %v1350_v25 = vrot.slane %v1343_v57, 2  ;;  %v2096_v35 = vpop.f32.mrb[25].mxu1 }
0x249a   :  { %v1346_v26 = vpop.f32.mrb[26].mxu1 }
0x249b   :  { %v1352_v3 = vadd.f32 %v1350_v25, %v2763_v55  ;;  %v2097_v27 = vpop.f32.mrb[27].mxu1 }
0x249d   :  { %2258 = vtanh.f32 %v1352_v3  ;;  %v1938_v30 = vmul.f32 -1.442695, %v1352_v3 }
0x249f   :  { %2260 = vpow2.f32 %v1938_v30 }
0x24a7   :  { %v2259_v60 = vpop.eup %2258 }
0x24a8   :  { %1367 = vrot.lane.b32.xlu0 %v2259_v60, %s2383_s25 }
0x24a9   :  { %v2261_v29 = vpop.eup %2260 }
0x24aa   :  { %v1356_v63 = vadd.f32 1.0, %v2261_v29 }
0x24ac   :  { %2262 = vrcp.f32 %v1356_v63 }
0x24b6   :  { %v2263_v31 = vpop.eup %2262 }
0x24b7   :  { %v1365_v38 = vmul.f32 %v2263_v31, %v1363_v34 }
0x251a   :  { %v1368_v33 = vpop.permute.xlu0 %1367 }
0x251b   :  { %v1370_v51 = vmul.f32 %v2263_v31, %v1368_v33 }
0x251d   :  { %1372 = vrot.lane.b32.xlu0 %v1370_v51, %s2383_s25 }
0x258f   :  { %v1373_v39 = vpop.permute.xlu0 %1372 }
0x2590   :  { %v1375_v41 = vadd.f32 %v1373_v39, %v1365_v38 }
0x2592   :  { %1377 = vrot.lane.b32.xlu1 %v1375_v41, %s2384_s26 }
0x2604   :  { %v1378_v55 = vpop.permute.xlu1 %1377 }
0x2605   :  { %v1380_v37 = vmul.f32 %v1378_v55, %v2569_v28 }
0x2607   :  { %2264 = vtanh.f32 %v1380_v37  ;;  %v1451_v9 = vrot.slane %v1380_v37, 6 }
0x2611   :  { %v2265_v6 = vpop.eup %2264 }
0x2612   :  { %1383 = vrot.lane.b32.xlu0 %v2265_v6, %s2378_s3 }
0x2684   :  { %v1384_v42 = vpop.permute.xlu0 %1383 }
0x2685   :  { %v1386_v44 = vmul.f32 %v2263_v31, %v1384_v42 }
0x2687   :  { %1388 = vrot.lane.b32.xlu1 %v1386_v44, %s2378_s3 }
0x268b   :  { %1452 = vrot.lane.b32.xlu1 %v1451_v9, %s2383_s25 }
0x26f9   :  { %v1389_v45 = vpop.permute.xlu1 %1388 }
0x26fa   :  { %v1391_v46 = vmul.f32 %v1389_v45, %v2569_v28 }
0x26fc   :  { %v1396_v49 = vpack.c.bf16 %v1391_v46, %v1391_v46  ;;  %v2835_v12 = vsel %vm906_vm7, %v1751_v23, %v1391_v46  ;;  %v1769_v15 = vrot.slane %v1391_v46, 6 }
0x26fd   :  { %v1453_v10 = vpop.permute.xlu1 %1452 }
0x26fe   :  { %v1398_v59 = vrot.slane %v1396_v49, 3  ;;  %v1783_v61 = vsel %vm902_vm5, %v1769_v15, %v1772_v48 }
0x26ff   :  { %v2840_v40 = vsel %vm904_vm6, %v1783_v61, %v1775_v58 }
0x2700   :  { %2103 = vmatmul.mubr.msk.bf16.vlgmr.msra.gmra.mrb[28].mxu0 %vm135_vm1, %v1398_v59 }
0x2701   :  { %2115 = vmatpush3.bf16.msra.mxu0 %v2707_v8  ;;  %2118 = vmatprep.mubr.msk.bf16.mxu0 %vm2382_vm0, %v2380_v0 }
0x2702   :  { %2116 = vmatprep.subr.bf16.mxu0 %v2380_v0 }
0x2705   :  { %2117 = vmatpush3.bf16.msra.mxu0 %v2715_v11 }
0x2706   :  { %2130 = vmatprep.subr.bf16.mxu0 %v2380_v0 }
0x27d3   :  { %v1436_v28 = vpop.f32.mrb[28].mxu0 }
0x27d4   :  { %v1442_v43 = vadd.f32 %v1436_v28, %v2759_v50  ;;  %v2104_v62 = vpop.f32.mrb[29].mxu0 }
0x27d5   :  { %v1439_v56 = vpop.f32.mrb[30].mxu0 }
0x27d6   :  { %2266 = vtanh.f32 %v1442_v43  ;;  %v2105_v32 = vpop.f32.mrb[31].mxu0  ;;  %v1940_v36 = vmul.f32 -1.442695, %v1442_v43 }
0x27d8   :  { %2268 = vpow2.f32 %v1940_v36 }
0x27e0   :  { %v2267_v54 = vpop.eup %2266 }
0x27e1   :  { %1457 = vrot.lane.b32.xlu0 %v2267_v54, %s2383_s25 }
0x27e2   :  { %v2269_v2 = vpop.eup %2268 }
0x27e3   :  { %v1446_v4 = vadd.f32 1.0, %v2269_v2 }
0x27e5   :  { %2270 = vrcp.f32 %v1446_v4 }
0x27ef   :  { %v2271_v13 = vpop.eup %2270 }
0x27f0   :  { %v1455_v14 = vmul.f32 %v2271_v13, %v1453_v10 }
0x2853   :  { %v1458_v5 = vpop.permute.xlu0 %1457 }
0x2854   :  { %v1460_v7 = vmul.f32 %v2271_v13, %v1458_v5 }
0x2856   :  { %1462 = vrot.lane.b32.xlu0 %v1460_v7, %s2383_s25 }
0x28c8   :  { %v1463_v16 = vpop.permute.xlu0 %1462 }
0x28c9   :  { %v1465_v18 = vadd.f32 %v1463_v16, %v1455_v14 }
0x28cb   :  { %1467 = vrot.lane.b32.xlu1 %v1465_v18, %s2384_s26 }
0x293d   :  { %v1468_v19 = vpop.permute.xlu1 %1467 }
0x293e   :  { %v1470_v21 = vmul.f32 %v1468_v19, %v2638_v20 }
0x2940   :  { %2272 = vtanh.f32 %v1470_v21  ;;  %v1541_v57 = vrot.slane %v1470_v21, 6 }
0x294a   :  { %v2273_v22 = vpop.eup %2272 }
0x294b   :  { %1473 = vrot.lane.b32.xlu0 %v2273_v22, %s2378_s3 }
0x29bd   :  { %v1474_v23 = vpop.permute.xlu0 %1473 }
0x29be   :  { %v1476_v24 = vmul.f32 %v2271_v13, %v1474_v23 }
0x29c0   :  { %1478 = vrot.lane.b32.xlu1 %v1476_v24, %s2378_s3 }
0x29c4   :  { %1542 = vrot.lane.b32.xlu1 %v1541_v57, %s2383_s25 }
0x2a32   :  { %v1479_v25 = vpop.permute.xlu1 %1478 }
0x2a33   :  { %v2858_v35 = vmul.f32 %v1479_v25, %v2638_v20 }
0x2a35   :  { %v1485_v26 = vpack.c.bf16 %v2858_v35, %v2858_v35 }
0x2a37   :  { %2111 = vmatmul.mubr.msk.bf16.vlgmr.msra.gmra.mrb[28].mxu1 %vm135_vm1, %v1485_v26 }
0x2a38   :  { %2123 = vmatpush3.bf16.msra.mxu1 %v2707_v8  ;;  %2126 = vmatprep.mubr.msk.bf16.mxu1 %vm2382_vm0, %v2380_v0 }
0x2a39   :  { %2124 = vmatprep.subr.bf16.mxu1 %v2380_v0 }
0x2a3c   :  { %2125 = vmatpush3.bf16.msra.mxu1 %v2715_v11  ;;  %v1543_v11 = vpop.permute.xlu1 %1542 }
0x2b0a   :  { %v1523_v3 = vpop.f32.mrb[28].mxu1 }
0x2b0b   :  { %v1530_v27 = vrot.slane %v1523_v3, 6  ;;  %v2112_v60 = vpop.f32.mrb[29].mxu1 }
0x2b0c   :  { %v1526_v30 = vpop.f32.mrb[30].mxu1 }
0x2b0d   :  { %v1532_v29 = vadd.f32 %v1530_v27, %v2757_v47  ;;  %v2113_v63 = vpop.f32.mrb[31].mxu1 }
0x2b0f   :  { %2274 = vtanh.f32 %v1532_v29  ;;  %v1942_v33 = vmul.f32 -1.442695, %v1532_v29 }
0x2b11   :  { %2276 = vpow2.f32 %v1942_v33 }
0x2b19   :  { %v2275_v31 = vpop.eup %2274 }
0x2b1a   :  { %1547 = vrot.lane.b32.xlu0 %v2275_v31, %s2383_s25 }
0x2b1b   :  { %v2277_v8 = vpop.eup %2276 }
0x2b1c   :  { %v1536_v51 = vadd.f32 1.0, %v2277_v8 }
0x2b1e   :  { %2278 = vrcp.f32 %v1536_v51 }
0x2b28   :  { %v2279_v34 = vpop.eup %2278 }
0x2b29   :  { %v1545_v41 = vmul.f32 %v2279_v34, %v1543_v11 }
0x2b8c   :  { %v1548_v38 = vpop.permute.xlu0 %1547 }
0x2b8d   :  { %v1550_v39 = vmul.f32 %v2279_v34, %v1548_v38 }
0x2b8f   :  { %1552 = vrot.lane.b32.xlu0 %v1550_v39, %s2383_s25 }
0x2c01   :  { %v1553_v55 = vpop.permute.xlu0 %1552 }
0x2c02   :  { %v1555_v37 = vadd.f32 %v1553_v55, %v1545_v41 }
0x2c04   :  { %1557 = vrot.lane.b32.xlu1 %v1555_v37, %s2384_s26 }
0x2c76   :  { %v1558_v6 = vpop.permute.xlu1 %1557 }
0x2c77   :  { %v1560_v42 = vmul.f32 %v1558_v6, %v2664_v52 }
0x2c79   :  { %2280 = vtanh.f32 %v1560_v42  ;;  %v1630_v46 = vrot.slane %v1560_v42, 6 }
0x2c83   :  { %v2281_v44 = vpop.eup %2280 }
0x2c84   :  { %1563 = vrot.lane.b32.xlu0 %v2281_v44, %s2378_s3 }
0x2cf6   :  { %v1564_v9 = vpop.permute.xlu0 %1563 }
0x2cf7   :  { %v1566_v45 = vmul.f32 %v2279_v34, %v1564_v9  ;;  %v2168_v9 = vld [vmem:[#allocation5] sm:$0xff]  }
0x2cf9   :  { %1568 = vrot.lane.b32.xlu1 %v1566_v45, %s2378_s3  ;;  %v1857_v45 = vld [vmem:[%s2969_s1 + $0x8] sm:$0xff] }
0x2cfa   :  { %vm1859_vm9 = vcmp.ne.s32.totalorder %v1857_v45, 0 }
0x2cfd   :  { %1631 = vrot.lane.b32.xlu1 %v1630_v46, %s2383_s25  ;;  %v2169_v46 = vld [vmem:[#allocation5 + $0x8] sm:$0xff]  }
0x2d6b   :  { %v1569_v48 = vpop.permute.xlu1 %1568 }
0x2d6c   :  { %v2877_v49 = vmul.f32 %v1569_v48, %v2664_v52  ;;  %v2298_v48 = vld [vmem:[%s2968_s0 + $0x8] sm:$0xff] }
0x2d6d   :  { %vm1861_vm8 = vcmp.eq.s32.totalorder %v2298_v48, 5 }
0x2d6e   :  { %v1572_v15 = vpack.c.bf16 %v2877_v49, %v2877_v49  ;;  %v1753_v25 = vsel %vm902_vm5, %v2858_v35, %v2877_v49  ;;  %vm1863_vm10 = vmor %vm1859_vm9, %vm1861_vm8 }
0x2d6f   :  { %v1632_v7 = vpop.permute.xlu1 %1631 }
0x2d70   :  { %v1574_v58 = vrot.slane %v1572_v15, 1 }
0x2d72   :  { %2119 = vmatmul.mubr.msk.bf16.vlgmr.msra.gmra.mrb[32].mxu0 %vm135_vm1, %v1574_v58 }
0x2d73   :  { %2134 = vmatprep.mubr.msk.bf16.mxu0 %vm2382_vm0, %v2380_v0  ;;  %2131 = vmatpush3.bf16.msra.mxu0 %v2168_v9 }
0x2d74   :  { %2132 = vmatprep.subr.bf16.mxu0 %v2380_v0  ;;  %v1856_v0 = vld [vmem:[%s2969_s1] sm:$0xff] }
0x2d75   :  { %vm1858_vm12 = vcmp.ne.s32.totalorder %v1856_v0, 0 }
0x2d77   :  { %2133 = vmatpush3.bf16.msra.mxu0 %v2169_v46 }
0x2e45   :  { %v1612_v59 = vpop.f32.mrb[32].mxu0 }
0x2e46   :  { %v1619_v61 = vrot.slane %v1612_v59, 4  ;;  %v2120_v28 = vpop.f32.mrb[33].mxu0  ;;  %v1865_v59 = vsel %vm1863_vm10, 1, %v2381_v1 }
0x2e47   :  { %v1615_v43 = vpop.f32.mrb[34].mxu0 }
0x2e48   :  { %v1621_v62 = vadd.f32 %v1619_v61, %v2759_v50  ;;  %v2121_v56 = vpop.f32.mrb[35].mxu0  ;;  %v2299_v61 = vld [vmem:[%s2968_s0] sm:$0xff] }
0x2e49   :  { %vm1860_vm11 = vcmp.eq.s32.totalorder %v2299_v61, 5 }
0x2e4a   :  { %2282 = vtanh.f32 %v1621_v62  ;;  %v1944_v54 = vmul.f32 -1.442695, %v1621_v62  ;;  %vm1862_vm13 = vmor %vm1858_vm12, %vm1860_vm11  ;;  %v1778_v62 = vrot.slane %v2774_v17, 2 }
0x2e4b   :  { %v1864_v28 = vsel %vm1862_vm13, 1, %v2381_v1  ;;  %v1766_v1 = vrot.slane %v2858_v35, 2 }
0x2e4c   :  { %2284 = vpow2.f32 %v1944_v54  ;;  %v1785_v54 = vsel %vm906_vm7, %v2840_v40, %v1778_v62 }
0x2e54   :  { %v2283_v32 = vpop.eup %2282 }
0x2e55   :  { %1636 = vrot.lane.b32.xlu0 %v2283_v32, %s2383_s25 }
0x2e56   :  { %v2285_v36 = vpop.eup %2284 }
0x2e57   :  { %v1625_v2 = vadd.f32 1.0, %v2285_v36 }
0x2e59   :  { %2286 = vrcp.f32 %v1625_v2 }
0x2e63   :  { %v2287_v4 = vpop.eup %2286 }
0x2e64   :  { %v1634_v10 = vmul.f32 %v2287_v4, %v1632_v7 }
0x2ec7   :  { %v1637_v13 = vpop.permute.xlu0 %1636 }
0x2ec8   :  { %v1639_v5 = vmul.f32 %v2287_v4, %v1637_v13 }
0x2eca   :  { %1641 = vrot.lane.b32.xlu0 %v1639_v5, %s2383_s25 }
0x2f3c   :  { %v1642_v14 = vpop.permute.xlu0 %1641 }
0x2f3d   :  { %v1644_v16 = vadd.f32 %v1642_v14, %v1634_v10 }
0x2f3f   :  { %1646 = vrot.lane.b32.xlu1 %v1644_v16, %s2384_s26 }
0x2fb1   :  { %v1647_v50 = vpop.permute.xlu1 %1646 }
0x2fb2   :  { %v1649_v18 = vmul.f32 %v1647_v50, %v2638_v20 }
0x2fb4   :  { %2288 = vtanh.f32 %v1649_v18  ;;  %v1719_v23 = vrot.slane %v1649_v18, 6 }
0x2fbe   :  { %v2289_v19 = vpop.eup %2288 }
0x2fbf   :  { %1652 = vrot.lane.b32.xlu0 %v2289_v19, %s2378_s3 }
0x3031   :  { %v1653_v21 = vpop.permute.xlu0 %1652 }
0x3032   :  { %v1655_v22 = vmul.f32 %v2287_v4, %v1653_v21  ;;  %v1763_v4 = vrot.slane %v2877_v49, 6  ;;  %v1947_v49 = vld [vmem:[%s2975_s7] ss:$0 sm:$0xff] }
0x3034   :  { %1657 = vrot.lane.b32.xlu1 %v1655_v22, %s2378_s3  ;;  %v2301_v22 = vld [vmem:[%s2970_s2 + $0x8] sm:$0xff] }
0x3038   :  { %1720 = vrot.lane.b32.xlu1 %v1719_v23, %s2383_s25 }
0x30a6   :  { %v1658_v24 = vpop.permute.xlu1 %1657 }
0x30a7   :  { %v2893_v57 = vmul.f32 %v1658_v24, %v2638_v20 }
0x30a9   :  { %v1661_v26 = vpack.c.bf16 %v2893_v57, %v2893_v57  ;;  %v1754_v3 = vsel %vm904_vm6, %v1753_v25, %v2893_v57  ;;  %v1760_v32 = vrot.slane %v2893_v57, 2 }
0x30aa   :  { %v1721_v41 = vpop.permute.xlu1 %1720 }
0x30ab   :  { %v1663_v27 = vrot.slane %v1661_v26, 2 }
0x30ad   :  { %2127 = vmatmul.mubr.msk.bf16.vlgmr.msra.gmra.mrb[32].mxu1 %vm135_vm1, %v1663_v27 }
0x3180   :  { %v1701_v60 = vpop.f32.mrb[32].mxu1 }
0x3181   :  { %v1708_v30 = vrot.slane %v1701_v60, 2  ;;  %v2128_v29 = vpop.f32.mrb[33].mxu1 }
0x3182   :  { %v1704_v63 = vpop.f32.mrb[34].mxu1 }
0x3183   :  { %v1710_v20 = vadd.f32 %v1708_v30, %v2757_v47  ;;  %v2129_v31 = vpop.f32.mrb[35].mxu1 }
0x3185   :  { %2290 = vtanh.f32 %v1710_v20  ;;  %v1946_v8 = vmul.f32 -1.442695, %v1710_v20 }
0x3187   :  { %2292 = vpow2.f32 %v1946_v8 }
0x318f   :  { %v2291_v33 = vpop.eup %2290 }
0x3190   :  { %1725 = vrot.lane.b32.xlu0 %v2291_v33, %s2383_s25 }
0x3191   :  { %v2293_v51 = vpop.eup %2292 }
0x3192   :  { %v1714_v34 = vadd.f32 1.0, %v2293_v51 }
0x3194   :  { %2294 = vrcp.f32 %v1714_v34 }
0x319e   :  { %v2295_v38 = vpop.eup %2294 }
0x319f   :  { %v1723_v55 = vmul.f32 %v2295_v38, %v1721_v41 }
0x3202   :  { %v1726_v39 = vpop.permute.xlu0 %1725 }
0x3203   :  { %v1728_v11 = vmul.f32 %v2295_v38, %v1726_v39 }
0x3205   :  { %1730 = vrot.lane.b32.xlu0 %v1728_v11, %s2383_s25 }
0x3277   :  { %v1731_v37 = vpop.permute.xlu0 %1730 }
0x3278   :  { %v1733_v6 = vadd.f32 %v1731_v37, %v1723_v55 }
0x327a   :  { %1735 = vrot.lane.b32.xlu1 %v1733_v6, %s2384_s26 }
0x32ec   :  { %v1736_v47 = vpop.permute.xlu1 %1735 }
0x32ed   :  { %v1738_v42 = vmul.f32 %v1736_v47, %v2664_v52 }
0x32ef   :  { %2296 = vtanh.f32 %v1738_v42 }
0x32f9   :  { %v2297_v44 = vpop.eup %2296 }
0x32fa   :  { %1741 = vrot.lane.b32.xlu0 %v2297_v44, %s2378_s3 }
0x32fe   :  { %1867 = vperm.xlu0 %2151, %v1864_v28  }
0x336c   :  { %v1742_v15 = vpop.permute.xlu0 %1741 }
0x336d   :  { %v1744_v58 = vmul.f32 %v2295_v38, %v1742_v15 }
0x336f   :  { %1746 = vrot.lane.b32.xlu1 %v1744_v58, %s2378_s3  ;;  %s2385_s3 = smov [#allocation7]  }
0x3370   :  { %s1883_s18 = sshll.u32 %s2385_s3, 4  ;;  %s1884_s18 = int_to_ptr.vmem [resolvable:$true] %s1883_s18 }
0x3371   :  { %s2346_s22 = scalar_lea.vmem %s1884_s18, 256  ;;  %p2351_p3 = scmp.lt.s32.totalorder %s1884_s18, %s1884_s18 }
0x3372   :  { %p2347_p2 = scmp.ne.s32.totalorder %s1884_s18, %s2346_s22  ;;  %p2352_p4 = scmp.lt.s32.totalorder %s2346_s22, %s2346_s22 }
0x3373   :  { %1870 = vperm.xlu1 %2150, %v1865_v59  }
0x3374   :  { %p2353_p5 = por %p2352_p4, %p2351_p3 }
0x3376   :  { %p2354_p6 = pnand %p2353_p5, %p2347_p2 }
0x337d   :  { %v1868_v10 = vpop.permute.xlu0 %1867 }
0x337e   :  { %vm1872_vm14 = vcmp.eq.s32.totalorder %v1868_v10, 1 }
0x33e1   :  { %v1747_v43 = vpop.permute.xlu1 %1746 }
0x33e2   :  { %v1749_v56 = vmul.f32 %v1747_v43, %v2664_v52 }
0x33e4   :  { %v1755_v36 = vsel %vm906_vm7, %v1754_v3, %v1749_v56  ;;  %v1757_v2 = vrot.slane %v1749_v56, 6 }
0x33e5   :  { %v1787_v13 = vsel %vm69_vm4, %v1755_v36, %v1785_v54 }
0x33e6   :  { %v1780_v5 = vsel %vm902_vm5, %v1757_v2, %v1760_v32 }
0x33e7   :  { %v1781_v17 = vsel %vm904_vm6, %v1780_v5, %v1763_v4 }
0x33e8   :  { %v1782_v52 = vsel %vm906_vm7, %v1781_v17, %v1766_v1 }
0x33e9   :  { %v1786_v40 = vsel %vm69_vm4, %v2835_v12, %v1782_v52 }
0x33ea   :  { %v1788_v7 = vpack.c.bf16 %v1787_v13, %v1786_v40 }
0x33ec   :  { %2135 = vmatmul.mubr.msk.bf16.vlgmr.msra.gmra.mrb[36].mxu0 %vm135_vm1, %v1788_v7 }
0x33f2   :  { %v1871_v35 = vpop.permute.xlu1 %1870 }
0x33f3   :  { %vm1873_vm15 = vcmp.eq.s32.totalorder %v1871_v35, 1 }
0x34bf   :  { %v1849_v14 = vpop.f32.mrb[36].mxu0 }
0x34c0   :  { %v1850_v16 = vadd.f32 %v1947_v49, %v1849_v14  ;;  %v2136_v50 = vpop.f32.mrb[37].mxu0 }
0x34c1   :  { %v1852_v18 = vpop.f32.mrb[38].mxu0 }
0x34c2   :  { %v1874_v12 = vsel %vm1872_vm14, %v2300_v53, %v1850_v16  ;;  %v1853_v19 = vadd.f32 %v1947_v49, %v1852_v18  ;;  %v2137_v21 = vpop.f32.mrb[39].mxu0 }
0x34c3   :  { %1876 = vst.msk [vmem:[#allocation7] sm:$0xff] %vm135_vm1, %v1874_v12 }
0x34c4   :  { %v1875_v23 = vsel %vm1873_vm15, %v2301_v22, %v1853_v19 }
0x34c5   :  { %1877 = vst.msk [vmem:[#allocation7 + $0x8] sm:$0xff] %vm135_vm1, %v1875_v23 }
0x34c6   :  { %2357 = shalt.err (!%p2354_p6)
}
0x34c7   :  { %s2358_s25 = scalar_lea.hbm %s2976_s8, 256 }
0x34c8   :  { %p2359_p7 = scmp.ne.s32.totalorder %s2976_s8, %s2358_s25  ;;  %p2362_p8 = scmp.lt.u32.totalorder %s2358_s25, %s2976_s8 }
0x34ca   :  { %p2364_p9 = pnand %p2362_p8, %p2359_p7 }
0x34cc   :  { %2367 = shalt.err (!%p2364_p9)
}
0x34cd   :  { %1889 = dma.vmem_to_hbm [thread:$0]  %s1884_s18, 256, %s2976_s8, [#allocation4], %s2375_s15, %s2375_s15, %s2376_s16  }
0x34ce   :  { %2372 = dma.done.wait [#allocation4], 256  }
0x34cf   :  { %2373 = vsyncadd [#allocation4], 4294967040 }
0x34d0   :  { %1893 = vsyncpa [#allocation3], 1 }
0x34d1   :  { %1894 = vsyncpa [#allocation6], 1 }
0x34d2   :  { %1895 = vsyncpa [#allocation4], 1 }

</bundles_post_ra>
